<compile_context>
chip_gen: v5e
topology: v5e:2x2
jax: 0.10.0
libtpu: 0.0.40
codegen_flags: <defaults>
</compile_context>

<pallas_src>
import itertools

import jax
import jax.numpy as jnp
import numpy as np
from jax.experimental import pallas as pl
from jax.experimental.pallas import tpu as pltpu


def _round_up(x, m):
    return ((x + m - 1) // m) * m


# ----------------------------------------------------------------------------
# Pallas kernel: cost(b, i, j) for one (batch, pred-tile) block, reducing over
# the flattened C*H*W axis (grid axis 2).  Output block is resident across k.
# ----------------------------------------------------------------------------
def _matcher_cost_kernel(ph_ref, b1_ref, b2_ref, b3_ref, po0_ref, po1_ref,
                         gw_ref, gg0_ref, gg1_ref, gc_ref, out_ref):
    k = pl.program_id(2)

    @pl.when(k == 0)
    def _init():
        out_ref[...] = jnp.zeros_like(out_ref)

    # ---- pred-only heatmap features for this K tile ----
    x = ph_ref[0].astype(jnp.float32)                    # (tile_n, tk)
    # Shared transcendental: one exp feeds both sigmoid and softplus; the
    # reciprocal goes to the EUP as an approx op (separate slot, ~free).
    e = jnp.exp(-jnp.abs(x))
    r = pl.reciprocal(1.0 + e, approx=True)
    p = jnp.where(x >= 0.0, r, e * r)                    # sigmoid(x)
    sp = jnp.maximum(x, 0.0) + jnp.log(1.0 + e)          # softplus(x)
    p2 = p * p
    omp = 1.0 - p
    a1 = (sp * p2).astype(jnp.bfloat16)
    a2 = (x * p2).astype(jnp.bfloat16)
    a3 = ((sp - x) * (omp * omp)).astype(jnp.bfloat16)

    # Focal heatmap cost: three bf16 MXU matmuls, f32 accumulation directly
    # into the resident output block (B-side already pre-transposed on host).
    out_ref[0] += (
        jnp.dot(a1, b1_ref[0], preferred_element_type=jnp.float32)
        + jnp.dot(a2, b2_ref[0], preferred_element_type=jnp.float32)
        + jnp.dot(a3, b3_ref[0], preferred_element_type=jnp.float32))

    @pl.when(k == pl.num_programs(2) - 1)
    def _finalize():
        # L2 offset cost via ||a-b||^2 = ||a||^2 - 2 a.b + ||b||^2 (tiny
        # matmuls + a broadcast constant).  Runs once per (b, i) tile.
        p0 = jax.nn.sigmoid(po0_ref[0])                  # (tile_n, C)
        p1 = jax.nn.sigmoid(po1_ref[0])
        p_sq = p0 * p0 + p1 * p1
        out_ref[0] += (
            jnp.dot(p_sq, gw_ref[0], preferred_element_type=jnp.float32)
            + jnp.dot(p0, gg0_ref[0], preferred_element_type=jnp.float32)
            + jnp.dot(p1, gg1_ref[0], preferred_element_type=jnp.float32)
            + gc_ref[0])


# ----------------------------------------------------------------------------
# Wrapper: one pallas_call for the whole batch.
# ----------------------------------------------------------------------------
def matcher_cost_batched(pred_hms, pred_scores, pred_offsets, gt_heatmaps,
                         gt_offsets, hms_weight=2.0, score_weight=1.0,
                         offset_weight=1.0, alpha=0.25,
                         stream_dtype=jnp.bfloat16):
    """Returns (B, N_pad, n_pad) f32 cost; valid region is [:, :N, :n_b]."""
    B, N, C, H, W = pred_hms.shape
    HW = H * W
    CHW = C * HW
    n_list = [int(g.shape[0]) for g in gt_heatmaps]
    n_pad = _round_up(max(max(n_list), 1), 8)

    # Tile sizes: large pred tile amortizes B-side refetch + per-step overhead.
    tk = min(2048, _round_up(CHW, 128))
    chw_pad = _round_up(CHW, tk)
    tile_n = min(256, _round_up(N, 8))
    n_pred_pad = _round_up(N, tile_n)
    # v7x has 2 TensorCores: try to provide >= 2 "parallel" grid slices.
    while B * (n_pred_pad // tile_n) < 2 and tile_n > 8:
        tile_n = max(8, tile_n // 2)
        n_pred_pad = _round_up(N, tile_n)

    f32 = jnp.float32

    # ---- pred side: lane-dense, bf16 streamed heatmaps ----
    ph = pred_hms.reshape(B, N, CHW).astype(f32)
    ph = jnp.pad(ph, ((0, 0), (0, n_pred_pad - N), (0, chw_pad - CHW)))
    ph = ph.astype(stream_dtype)
    po = pred_offsets.astype(f32)                              # (B, N, C, 2)
    po0 = jnp.pad(po[..., 0], ((0, 0), (0, n_pred_pad - N), (0, 0)))
    po1 = jnp.pad(po[..., 1], ((0, 0), (0, n_pred_pad - N), (0, 0)))

    # ---- gt side: tiny, pred-independent -> precompute matmul features ----
    ghm = jnp.stack([
        jnp.pad(jnp.asarray(g, f32).reshape(n_list[b], C, HW),
                ((0, n_pad - n_list[b]), (0, 0), (0, 0)))
        for b, g in enumerate(gt_heatmaps)])                   # (B, n_pad, C, HW)
    goff = jnp.stack([
        jnp.pad(jnp.asarray(g, f32), ((0, n_pad - n_list[b]), (0, 0), (0, 0)))
        for b, g in enumerate(gt_offsets)])                    # (B, n_pad, C, 2)

    keep = (jnp.sum(ghm, axis=-1) != 0.0).astype(f32)          # (B, n_pad, C)
    num_kp = jnp.maximum(jnp.sum(keep, axis=-1), 1.0)          # (B, n_pad)
    scale = keep / num_kp[..., None]                           # (B, n_pad, C)

    m1 = (ghm == 1.0).astype(f32)
    omt = 1.0 - ghm
    omt4 = (omt * omt) * (omt * omt)                           # (1 - t)^4
    s4 = (hms_weight * scale)[..., None]

    def _bmat(a):
        # (B, n_pad, C, HW) -> pre-transposed (B, chw_pad, n_pad) bf16, so the
        # kernel dot contracts over the sublane axis (no in-kernel .T).
        a = jnp.pad(a.reshape(B, n_pad, CHW),
                    ((0, 0), (0, 0), (0, chw_pad - CHW)))
        return jnp.transpose(a, (0, 2, 1)).astype(stream_dtype)

    b1 = _bmat(s4 * omt4)
    b2 = _bmat(-s4 * (ghm * omt4))
    b3 = _bmat(s4 * m1)

    w = (0.5 * offset_weight) * scale                          # (B, n_pad, C)
    gw = jnp.transpose(w, (0, 2, 1))                           # (B, C, n_pad)
    gg0 = jnp.transpose(-2.0 * w * goff[..., 0], (0, 2, 1))    # (B, C, n_pad)
    gg1 = jnp.transpose(-2.0 * w * goff[..., 1], (0, 2, 1))
    gc = jnp.sum(w * jnp.sum(goff * goff, axis=-1), axis=-1)   # (B, n_pad)
    gc = gc.reshape(B, 1, n_pad)

    grid = (B, n_pred_pad // tile_n, chw_pad // tk)

    cost = pl.pallas_call(
        _matcher_cost_kernel,
        out_shape=jax.ShapeDtypeStruct((B, n_pred_pad, n_pad), jnp.float32),
        grid_spec=pltpu.PrefetchScalarGridSpec(
            num_scalar_prefetch=0,
            grid=grid,
            in_specs=[
                pl.BlockSpec((1, tile_n, tk), lambda b, i, k: (b, i, k)),   # pred hm
                pl.BlockSpec((1, tk, n_pad), lambda b, i, k: (b, k, 0)),    # B1^T
                pl.BlockSpec((1, tk, n_pad), lambda b, i, k: (b, k, 0)),    # B2^T
                pl.BlockSpec((1, tk, n_pad), lambda b, i, k: (b, k, 0)),    # B3^T
                pl.BlockSpec((1, tile_n, C), lambda b, i, k: (b, i, 0)),    # pred off d0
                pl.BlockSpec((1, tile_n, C), lambda b, i, k: (b, i, 0)),    # pred off d1
                pl.BlockSpec((1, C, n_pad), lambda b, i, k: (b, 0, 0)),     # gt w
                pl.BlockSpec((1, C, n_pad), lambda b, i, k: (b, 0, 0)),     # gt -2*w*g0
                pl.BlockSpec((1, C, n_pad), lambda b, i, k: (b, 0, 0)),     # gt -2*w*g1
                pl.BlockSpec((1, 1, n_pad), lambda b, i, k: (b, 0, 0)),     # gt const
            ],
            out_specs=pl.BlockSpec((1, tile_n, n_pad), lambda b, i, k: (b, i, 0)),
        ),
        compiler_params=pltpu.CompilerParams(
            dimension_semantics=("parallel", "parallel", "arbitrary")),
    )(ph, b1, b2, b3, po0, po1, gw, gg0, gg1, gc)

    # ---- focal score cost (pred-only, O(B*N)): plain JAX, added by broadcast ----
    s = pred_scores.astype(f32)                                # (B, N, 1)
    p_s = jax.nn.sigmoid(s)
    ce_s = jnp.maximum(s, 0.0) - s + jnp.log1p(jnp.exp(-jnp.abs(s)))
    sc = (score_weight * alpha) * ce_s * (1.0 - p_s) * (1.0 - p_s)
    sc = jnp.pad(sc, ((0, 0), (0, n_pred_pad - N), (0, 0)))    # (B, N_pad, 1)
    return cost + sc


# ----------------------------------------------------------------------------
# Host-side Hungarian matching (same as the reference: cost goes to CPU/scipy).
# ----------------------------------------------------------------------------
def _linear_sum_assignment_cols(cost):
    """cost: (n, N). Returns matched pred index per gt row (== lsa(x)[1])."""
    try:
        from scipy.optimize import linear_sum_assignment
        return np.asarray(linear_sum_assignment(cost)[1], dtype=np.int64)
    except Exception:
        n, N = cost.shape
        best_sum, best_perm = None, None
        for perm in itertools.permutations(range(N), n):
            s = float(sum(cost[i, perm[i]] for i in range(n)))
            if best_sum is None or s < best_sum:
                best_sum, best_perm = s, perm
        return np.asarray(best_perm, dtype=np.int64)


def matcher_forward(pred_hms, gt_heatmaps, pred_scores, pred_offsets, gt_offsets,
                    hms_weight=2.0, score_weight=1.0, offset_weight=1.0):
    """Matcher.forward: list (len B) of int64 arrays of matched pred indices."""
    B, N = pred_hms.shape[:2]
    n_list = [int(g.shape[0]) for g in gt_heatmaps]
    cost = matcher_cost_batched(pred_hms, pred_scores, pred_offsets,
                                gt_heatmaps, gt_offsets,
                                hms_weight, score_weight, offset_weight)
    # Single device -> host transfer for the whole batch.
    cost_np = np.asarray(jax.block_until_ready(cost))
    indices = []
    for b, n_b in enumerate(n_list):
        # TODO(synk): Hungarian assignment has no clean Pallas equivalent; it
        # runs on host, exactly as the reference moves the cost to CPU/scipy.
        indices.append(_linear_sum_assignment_cols(cost_np[b, :N, :n_b].T))
    return indices


# ----------------------------------------------------------------------------
# Plain-JAX reference (mirror of Matcher.single_cost) for verification.
# ----------------------------------------------------------------------------
def _ref_cost(ph, ps, po, gh, go, hw=2.0, sw=1.0, ow=1.0,
              alpha=0.25, gamma=2.0, beta=4.0):
    mask_no_kp = jnp.sum(gh, axis=-1) == 0                          # (n, C)
    num_kp = jnp.maximum(jnp.sum((~mask_no_kp).astype(jnp.float32), axis=-1), 1.0)
    x = ph[:, None]
    t = gh[None]
    ce = jnp.maximum(x, 0.0) - x * t + jnp.log(1.0 + jnp.exp(-jnp.abs(x)))
    ce = jnp.where(mask_no_kp[None, :, :, None], 0.0, ce)
    p = jax.nn.sigmoid(x)
    m1 = (t == 1.0).astype(jnp.float32)
    m0 = 1.0 - m1
    p_t = ((1.0 - p) * m1 + p * m0) ** gamma
    ratio = m1 + ((1.0 - t) * m0) ** beta
    hm = jnp.sum(jnp.sum(ce * p_t * ratio, axis=-1), axis=-1) / num_kp[None]
    p_s = jax.nn.sigmoid(ps)
    ce_s = jnp.maximum(ps, 0.0) - ps + jnp.log(1.0 + jnp.exp(-jnp.abs(ps)))
    sc = alpha * ce_s * (1.0 - p_s) ** gamma                        # (N, 1)
    d = jax.nn.sigmoid(po)[:, None] - go[None]
    d2 = jnp.sum(d * d, axis=-1)
    d2 = jnp.where(mask_no_kp[None], 0.0, d2)
    off = jnp.sum(d2, axis=-1) / num_kp[None] / 2.0
    return hw * hm + sw * sc + ow * off


if __name__ == "__main__":
    key = jax.random.PRNGKey(0)
    B, N, C, H, W = 2, 8, 4, 16, 16
    n_per_batch = [3, 2]

    k1, k2, k3, k4 = jax.random.split(key, 4)
    pred_hms = jax.random.normal(k1, (B, N, C, H, W), jnp.float32)
    pred_scores = jax.random.normal(k2, (B, N, 1), jnp.float32)
    pred_offsets = jax.random.normal(k3, (B, N, C, 2), jnp.float32)

    gt_heatmaps, gt_offsets = [], []
    off_keys = jax.random.split(k4, B)
    for b, n in enumerate(n_per_batch):
        hm = np.zeros((n, C, H, W), np.float32)
        for i in range(n):
            for c in range(C):
                if (b + i + c) % 5 == 4:
                    continue  # empty channel -> exercises mask_no_kp
                y = (3 * b + 5 * i + 7 * c) % H
                x = (2 * b + 3 * i + 11 * c) % W
                hm[i, c, y, x] = 1.0
                hm[i, c, (y + 1) % H, x] = 0.5
        gt_heatmaps.append(jnp.asarray(hm))
        gt_offsets.append(jax.random.uniform(off_keys[b], (n, C, 2), jnp.float32))

    # Full forward: one fused Pallas cost kernel + host Hungarian matching.
    indices = matcher_forward(pred_hms, gt_heatmaps, pred_scores,
                              pred_offsets, gt_offsets)
    indices = [np.asarray(idx) for idx in indices]

    # Verify the Pallas cost matrices against the plain-JAX f32 reference.
    # Tolerance is 2e-2: pred heatmaps and gt focal features are streamed as
    # bf16 (with f32 MXU accumulation + approx EUP reciprocal), which costs
    # <~1% relative error — harmless for Hungarian matching.
    cost_all = np.asarray(jax.block_until_ready(
        matcher_cost_batched(pred_hms, pred_scores, pred_offsets,
                             gt_heatmaps, gt_offsets)))
    for b in range(B):
        n_b = gt_heatmaps[b].shape[0]
        gh = gt_heatmaps[b].reshape(n_b, C, H * W)
        ref = _ref_cost(pred_hms[b].reshape(N, C, H * W), pred_scores[b],
                        pred_offsets[b], gh, gt_offsets[b])
        np.testing.assert_allclose(cost_all[b, :N, :n_b], np.asarray(ref),
                                   rtol=2e-2, atol=2e-2)
        assert indices[b].shape == (n_b,)
        assert len(np.unique(indices[b])) == n_b  # valid one-to-one assignment

    print("KERNEL_OK")
</pallas_src>

<mosaic_0001>
module attributes {stable_mosaic.version = 11 : i64} {
  func.func @_matcher_cost_kernel(%arg0: i32, %arg1: i32, %arg2: i32, %arg3: memref<1x8x1024xbf16, #tpu.memory_space<vmem>>, %arg4: memref<1x1024x8xbf16, #tpu.memory_space<vmem>>, %arg5: memref<1x1024x8xbf16, #tpu.memory_space<vmem>>, %arg6: memref<1x1024x8xbf16, #tpu.memory_space<vmem>>, %arg7: memref<1x8x4xf32, #tpu.memory_space<vmem>>, %arg8: memref<1x8x4xf32, #tpu.memory_space<vmem>>, %arg9: memref<1x4x8xf32, #tpu.memory_space<vmem>>, %arg10: memref<1x4x8xf32, #tpu.memory_space<vmem>>, %arg11: memref<1x4x8xf32, #tpu.memory_space<vmem>>, %arg12: memref<1x1x8xf32, #tpu.memory_space<vmem>>, %arg13: memref<1x8x8xf32, #tpu.memory_space<vmem>>) attributes {dimension_semantics = [#tpu.dimension_semantics<parallel>, #tpu.dimension_semantics<parallel>, #tpu.dimension_semantics<arbitrary>], iteration_bounds = array<i64: 2, 1, 1>, scalar_prefetch = 0 : i64, scratch_operands = 0 : i64, tpu.core_type = #tpu.core_type<tc>, window_params = [{transform_indices = @transform_0, window_bounds = array<i64: 1, 8, 1024>}, {transform_indices = @transform_1, window_bounds = array<i64: 1, 1024, 8>}, {transform_indices = @transform_2, window_bounds = array<i64: 1, 1024, 8>}, {transform_indices = @transform_3, window_bounds = array<i64: 1, 1024, 8>}, {transform_indices = @transform_4, window_bounds = array<i64: 1, 8, 4>}, {transform_indices = @transform_5, window_bounds = array<i64: 1, 8, 4>}, {transform_indices = @transform_6, window_bounds = array<i64: 1, 4, 8>}, {transform_indices = @transform_7, window_bounds = array<i64: 1, 4, 8>}, {transform_indices = @transform_8, window_bounds = array<i64: 1, 4, 8>}, {transform_indices = @transform_9, window_bounds = array<i64: 1, 1, 8>}, {transform_indices = @transform_10, window_bounds = array<i64: 1, 8, 8>}]} {
    %c0_i32 = arith.constant 0 : i32
    %0 = arith.cmpi eq, %arg2, %c0_i32 : i32
    %1 = arith.extui %0 : i1 to i32
    %c0_i32_0 = arith.constant 0 : i32
    %2 = arith.cmpi ne, %1, %c0_i32_0 : i32
    scf.if %2 {
      %cst_28 = arith.constant 0.000000e+00 : f32
      %54 = vector.broadcast %cst_28 : f32 to vector<1x8x8xf32>
      %c0_29 = arith.constant 0 : index
      %c0_30 = arith.constant 0 : index
      %c0_31 = arith.constant 0 : index
      %55 = vector.load %arg13[%c0_29, %c0_30, %c0_31] : memref<1x8x8xf32, #tpu.memory_space<vmem>>, vector<1x8x8xf32>
      tpu.vector_store %arg13[%c0_29, %c0_30, %c0_31], %54 {strides = array<i32>} : memref<1x8x8xf32, #tpu.memory_space<vmem>>, vector<1x8x8xf32>,
    } else {
    }
    %c0 = arith.constant 0 : index
    %c0_1 = arith.constant 0 : index
    %c0_2 = arith.constant 0 : index
    %3 = vector.load %arg3[%c0, %c0_1, %c0_2] : memref<1x8x1024xbf16, #tpu.memory_space<vmem>>, vector<1x8x1024xbf16>
    %4 = vector.shape_cast %3 : vector<1x8x1024xbf16> to vector<8x1024xbf16>
    %5 = arith.extf %4 : vector<8x1024xbf16> to vector<8x1024xf32>
    %6 = math.absf %5 : vector<8x1024xf32>
    %cst = arith.constant 0.000000e+00 : f32
    %7 = vector.broadcast %cst : f32 to vector<8x1024xf32>
    %8 = arith.subf %7, %6 : vector<8x1024xf32>
    %9 = math.exp %8 : vector<8x1024xf32>
    %cst_3 = arith.constant 1.000000e+00 : f32
    %10 = vector.broadcast %cst_3 : f32 to vector<8x1024xf32>
    %11 = arith.addf %10, %9 : vector<8x1024xf32>
    %12 = tpu.reciprocal %11 {approx = true} : vector<8x1024xf32> -> vector<8x1024xf32>
    %cst_4 = arith.constant 0.000000e+00 : f32
    %13 = vector.broadcast %cst_4 : f32 to vector<8x1024xf32>
    %14 = arith.cmpf oge, %5, %13 : vector<8x1024xf32>
    %15 = arith.mulf %9, %12 : vector<8x1024xf32>
    %16 = arith.select %14, %12, %15 : vector<8x1024xi1>, vector<8x1024xf32>
    %cst_5 = arith.constant 0.000000e+00 : f32
    %17 = vector.broadcast %cst_5 : f32 to vector<8x1024xf32>
    %18 = arith.maximumf %5, %17 : vector<8x1024xf32>
    %cst_6 = arith.constant 1.000000e+00 : f32
    %19 = vector.broadcast %cst_6 : f32 to vector<8x1024xf32>
    %20 = arith.addf %19, %9 : vector<8x1024xf32>
    %21 = math.log %20 : vector<8x1024xf32>
    %22 = arith.addf %18, %21 : vector<8x1024xf32>
    %23 = arith.mulf %16, %16 : vector<8x1024xf32>
    %cst_7 = arith.constant 1.000000e+00 : f32
    %24 = vector.broadcast %cst_7 : f32 to vector<8x1024xf32>
    %25 = arith.subf %24, %16 : vector<8x1024xf32>
    %26 = arith.mulf %22, %23 : vector<8x1024xf32>
    %27 = arith.truncf %26 : vector<8x1024xf32> to vector<8x1024xbf16>
    %28 = arith.mulf %5, %23 : vector<8x1024xf32>
    %29 = arith.truncf %28 : vector<8x1024xf32> to vector<8x1024xbf16>
    %30 = arith.subf %22, %5 : vector<8x1024xf32>
    %31 = arith.mulf %25, %25 : vector<8x1024xf32>
    %32 = arith.mulf %30, %31 : vector<8x1024xf32>
    %33 = arith.truncf %32 : vector<8x1024xf32> to vector<8x1024xbf16>
    %c0_8 = arith.constant 0 : index
    %c0_9 = arith.constant 0 : index
    %c0_10 = arith.constant 0 : index
    %34 = vector.load %arg13[%c0_8, %c0_9, %c0_10] : memref<1x8x8xf32, #tpu.memory_space<vmem>>, vector<1x8x8xf32>
    %35 = vector.shape_cast %34 : vector<1x8x8xf32> to vector<8x8xf32>
    %c0_11 = arith.constant 0 : index
    %c0_12 = arith.constant 0 : index
    %c0_13 = arith.constant 0 : index
    %36 = vector.load %arg4[%c0_11, %c0_12, %c0_13] : memref<1x1024x8xbf16, #tpu.memory_space<vmem>>, vector<1x1024x8xbf16>
    %37 = vector.shape_cast %36 : vector<1x1024x8xbf16> to vector<1024x8xbf16>
    %cst_14 = arith.constant dense<0.000000e+00> : vector<8x8xf32>
    %38 = tpu.matmul %27, %37, %cst_14 {dimension_numbers = #tpu.dot_dimension_numbers<[1], [0], [0], [1], [0, 0, 1, 1], [], []>} : vector<8x1024xbf16>, vector<1024x8xbf16>, vector<8x8xf32> -> vector<8x8xf32>
    %c0_15 = arith.constant 0 : index
    %c0_16 = arith.constant 0 : index
    %c0_17 = arith.constant 0 : index
    %39 = vector.load %arg5[%c0_15, %c0_16, %c0_17] : memref<1x1024x8xbf16, #tpu.memory_space<vmem>>, vector<1x1024x8xbf16>
    %40 = vector.shape_cast %39 : vector<1x1024x8xbf16> to vector<1024x8xbf16>
    %cst_18 = arith.constant dense<0.000000e+00> : vector<8x8xf32>
    %41 = tpu.matmul %29, %40, %cst_18 {dimension_numbers = #tpu.dot_dimension_numbers<[1], [0], [0], [1], [0, 0, 1, 1], [], []>} : vector<8x1024xbf16>, vector<1024x8xbf16>, vector<8x8xf32> -> vector<8x8xf32>
    %42 = arith.addf %38, %41 : vector<8x8xf32>
    %c0_19 = arith.constant 0 : index
    %c0_20 = arith.constant 0 : index
    %c0_21 = arith.constant 0 : index
    %43 = vector.load %arg6[%c0_19, %c0_20, %c0_21] : memref<1x1024x8xbf16, #tpu.memory_space<vmem>>, vector<1x1024x8xbf16>
    %44 = vector.shape_cast %43 : vector<1x1024x8xbf16> to vector<1024x8xbf16>
    %cst_22 = arith.constant dense<0.000000e+00> : vector<8x8xf32>
    %45 = tpu.matmul %33, %44, %cst_22 {dimension_numbers = #tpu.dot_dimension_numbers<[1], [0], [0], [1], [0, 0, 1, 1], [], []>} : vector<8x1024xbf16>, vector<1024x8xbf16>, vector<8x8xf32> -> vector<8x8xf32>
    %46 = arith.addf %42, %45 : vector<8x8xf32>
    %47 = arith.addf %35, %46 : vector<8x8xf32>
    %c0_23 = arith.constant 0 : index
    %c0_24 = arith.constant 0 : index
    %c0_25 = arith.constant 0 : index
    %48 = vector.load %arg13[%c0_23, %c0_24, %c0_25] : memref<1x8x8xf32, #tpu.memory_space<vmem>>, vector<1x8x8xf32>
    %49 = vector.shape_cast %48 : vector<1x8x8xf32> to vector<8x8xf32>
    %50 = vector.shape_cast %47 : vector<8x8xf32> to vector<1x8x8xf32>
    tpu.vector_store %arg13[%c0_23, %c0_24, %c0_25], %50 {strides = array<i32>} : memref<1x8x8xf32, #tpu.memory_space<vmem>>, vector<1x8x8xf32>,
    %c0_i32_26 = arith.constant 0 : i32
    %51 = arith.cmpi eq, %arg2, %c0_i32_26 : i32
    %52 = arith.extui %51 : i1 to i32
    %c0_i32_27 = arith.constant 0 : i32
    %53 = arith.cmpi ne, %52, %c0_i32_27 : i32
    scf.if %53 {
      %c0_28 = arith.constant 0 : index
      %c0_29 = arith.constant 0 : index
      %c0_30 = arith.constant 0 : index
      %54 = vector.load %arg7[%c0_28, %c0_29, %c0_30] : memref<1x8x4xf32, #tpu.memory_space<vmem>>, vector<1x8x4xf32>
      %55 = vector.shape_cast %54 : vector<1x8x4xf32> to vector<8x4xf32>
      %56 = arith.negf %55 : vector<8x4xf32>
      %57 = math.exp %56 : vector<8x4xf32>
      %cst_31 = arith.constant 1.000000e+00 : f32
      %58 = vector.broadcast %cst_31 : f32 to vector<8x4xf32>
      %59 = arith.addf %58, %57 : vector<8x4xf32>
      %60 = arith.divf %58, %59 : vector<8x4xf32>
      %c0_32 = arith.constant 0 : index
      %c0_33 = arith.constant 0 : index
      %c0_34 = arith.constant 0 : index
      %61 = vector.load %arg8[%c0_32, %c0_33, %c0_34] : memref<1x8x4xf32, #tpu.memory_space<vmem>>, vector<1x8x4xf32>
      %62 = vector.shape_cast %61 : vector<1x8x4xf32> to vector<8x4xf32>
      %63 = arith.negf %62 : vector<8x4xf32>
      %64 = math.exp %63 : vector<8x4xf32>
      %cst_35 = arith.constant 1.000000e+00 : f32
      %65 = vector.broadcast %cst_35 : f32 to vector<8x4xf32>
      %66 = arith.addf %65, %64 : vector<8x4xf32>
      %67 = arith.divf %65, %66 : vector<8x4xf32>
      %68 = arith.mulf %60, %60 : vector<8x4xf32>
      %69 = arith.mulf %67, %67 : vector<8x4xf32>
      %70 = arith.addf %68, %69 : vector<8x4xf32>
      %c0_36 = arith.constant 0 : index
      %c0_37 = arith.constant 0 : index
      %c0_38 = arith.constant 0 : index
      %71 = vector.load %arg13[%c0_36, %c0_37, %c0_38] : memref<1x8x8xf32, #tpu.memory_space<vmem>>, vector<1x8x8xf32>
      %72 = vector.shape_cast %71 : vector<1x8x8xf32> to vector<8x8xf32>
      %c0_39 = arith.constant 0 : index
      %c0_40 = arith.constant 0 : index
      %c0_41 = arith.constant 0 : index
      %73 = vector.load %arg9[%c0_39, %c0_40, %c0_41] : memref<1x4x8xf32, #tpu.memory_space<vmem>>, vector<1x4x8xf32>
      %74 = vector.shape_cast %73 : vector<1x4x8xf32> to vector<4x8xf32>
      %cst_42 = arith.constant dense<0.000000e+00> : vector<8x8xf32>
      %75 = tpu.matmul %70, %74, %cst_42 {dimension_numbers = #tpu.dot_dimension_numbers<[1], [0], [0], [1], [0, 0, 1, 1], [], []>} : vector<8x4xf32>, vector<4x8xf32>, vector<8x8xf32> -> vector<8x8xf32>
      %c0_43 = arith.constant 0 : index
      %c0_44 = arith.constant 0 : index
      %c0_45 = arith.constant 0 : index
      %76 = vector.load %arg10[%c0_43, %c0_44, %c0_45] : memref<1x4x8xf32, #tpu.memory_space<vmem>>, vector<1x4x8xf32>
      %77 = vector.shape_cast %76 : vector<1x4x8xf32> to vector<4x8xf32>
      %cst_46 = arith.constant dense<0.000000e+00> : vector<8x8xf32>
      %78 = tpu.matmul %60, %77, %cst_46 {dimension_numbers = #tpu.dot_dimension_numbers<[1], [0], [0], [1], [0, 0, 1, 1], [], []>} : vector<8x4xf32>, vector<4x8xf32>, vector<8x8xf32> -> vector<8x8xf32>
      %79 = arith.addf %75, %78 : vector<8x8xf32>
      %c0_47 = arith.constant 0 : index
      %c0_48 = arith.constant 0 : index
      %c0_49 = arith.constant 0 : index
      %80 = vector.load %arg11[%c0_47, %c0_48, %c0_49] : memref<1x4x8xf32, #tpu.memory_space<vmem>>, vector<1x4x8xf32>
      %81 = vector.shape_cast %80 : vector<1x4x8xf32> to vector<4x8xf32>
      %cst_50 = arith.constant dense<0.000000e+00> : vector<8x8xf32>
      %82 = tpu.matmul %67, %81, %cst_50 {dimension_numbers = #tpu.dot_dimension_numbers<[1], [0], [0], [1], [0, 0, 1, 1], [], []>} : vector<8x4xf32>, vector<4x8xf32>, vector<8x8xf32> -> vector<8x8xf32>
      %83 = arith.addf %79, %82 : vector<8x8xf32>
      %c0_51 = arith.constant 0 : index
      %c0_52 = arith.constant 0 : index
      %c0_53 = arith.constant 0 : index
      %84 = vector.load %arg12[%c0_51, %c0_52, %c0_53] : memref<1x1x8xf32, #tpu.memory_space<vmem>>, vector<1x1x8xf32>
      %85 = vector.shape_cast %84 : vector<1x1x8xf32> to vector<1x8xf32>
      %86 = vector.broadcast %85 : vector<1x8xf32> to vector<8x8xf32>
      %87 = arith.addf %83, %86 : vector<8x8xf32>
      %88 = arith.addf %72, %87 : vector<8x8xf32>
      %c0_54 = arith.constant 0 : index
      %c0_55 = arith.constant 0 : index
      %c0_56 = arith.constant 0 : index
      %89 = vector.load %arg13[%c0_54, %c0_55, %c0_56] : memref<1x8x8xf32, #tpu.memory_space<vmem>>, vector<1x8x8xf32>
      %90 = vector.shape_cast %89 : vector<1x8x8xf32> to vector<8x8xf32>
      %91 = vector.shape_cast %88 : vector<8x8xf32> to vector<1x8x8xf32>
      tpu.vector_store %arg13[%c0_54, %c0_55, %c0_56], %91 {strides = array<i32>} : memref<1x8x8xf32, #tpu.memory_space<vmem>>, vector<1x8x8xf32>,
    } else {
    }
    return
  }
  func.func @transform_0(%arg0: i32, %arg1: i32, %arg2: i32) -> (i32, i32, i32) {
    %c0_i32 = arith.constant 0 : i32
    return %arg0, %arg1, %arg2 : i32, i32, i32
  }
  func.func @transform_1(%arg0: i32, %arg1: i32, %arg2: i32) -> (i32, i32, i32) {
    %c0_i32 = arith.constant 0 : i32
    %c0_i32_0 = arith.constant 0 : i32
    return %arg0, %arg2, %c0_i32 : i32, i32, i32
  }
  func.func @transform_2(%arg0: i32, %arg1: i32, %arg2: i32) -> (i32, i32, i32) {
    %c0_i32 = arith.constant 0 : i32
    %c0_i32_0 = arith.constant 0 : i32
    return %arg0, %arg2, %c0_i32 : i32, i32, i32
  }
  func.func @transform_3(%arg0: i32, %arg1: i32, %arg2: i32) -> (i32, i32, i32) {
    %c0_i32 = arith.constant 0 : i32
    %c0_i32_0 = arith.constant 0 : i32
    return %arg0, %arg2, %c0_i32 : i32, i32, i32
  }
  func.func @transform_4(%arg0: i32, %arg1: i32, %arg2: i32) -> (i32, i32, i32) {
    %c0_i32 = arith.constant 0 : i32
    %c0_i32_0 = arith.constant 0 : i32
    return %arg0, %arg1, %c0_i32 : i32, i32, i32
  }
  func.func @transform_5(%arg0: i32, %arg1: i32, %arg2: i32) -> (i32, i32, i32) {
    %c0_i32 = arith.constant 0 : i32
    %c0_i32_0 = arith.constant 0 : i32
    return %arg0, %arg1, %c0_i32 : i32, i32, i32
  }
  func.func @transform_6(%arg0: i32, %arg1: i32, %arg2: i32) -> (i32, i32, i32) {
    %c0_i32 = arith.constant 0 : i32
    %c0_i32_0 = arith.constant 0 : i32
    %c0_i32_1 = arith.constant 0 : i32
    return %arg0, %c0_i32, %c0_i32_0 : i32, i32, i32
  }
  func.func @transform_7(%arg0: i32, %arg1: i32, %arg2: i32) -> (i32, i32, i32) {
    %c0_i32 = arith.constant 0 : i32
    %c0_i32_0 = arith.constant 0 : i32
    %c0_i32_1 = arith.constant 0 : i32
    return %arg0, %c0_i32, %c0_i32_0 : i32, i32, i32
  }
  func.func @transform_8(%arg0: i32, %arg1: i32, %arg2: i32) -> (i32, i32, i32) {
    %c0_i32 = arith.constant 0 : i32
    %c0_i32_0 = arith.constant 0 : i32
    %c0_i32_1 = arith.constant 0 : i32
    return %arg0, %c0_i32, %c0_i32_0 : i32, i32, i32
  }
  func.func @transform_9(%arg0: i32, %arg1: i32, %arg2: i32) -> (i32, i32, i32) {
    %c0_i32 = arith.constant 0 : i32
    %c0_i32_0 = arith.constant 0 : i32
    %c0_i32_1 = arith.constant 0 : i32
    return %arg0, %c0_i32, %c0_i32_0 : i32, i32, i32
  }
  func.func @transform_10(%arg0: i32, %arg1: i32, %arg2: i32) -> (i32, i32, i32) {
    %c0_i32 = arith.constant 0 : i32
    %c0_i32_0 = arith.constant 0 : i32
    return %arg0, %arg1, %c0_i32 : i32, i32, i32
  }
}

</mosaic_0001>

<bundles_post_ra>
// kernel: tpu_custom_call.1
= control target key start
LH: loop header
LB: loop body
LE: loop exit
PB: predicated region body
PF: predicated region fallthrough
CT: control target
= control target key end

     0   :  { %s4934_s0 = inlined_call_operand.vmem [shape: bf16[2,8,1024], index: 0, kind: input, shape index: {}]   ;;  %s4935_s1 = inlined_call_operand.vmem [shape: bf16[2,1024,8], index: 1, kind: input, shape index: {}]   ;;  %s4936_s2 = inlined_call_operand.vmem [shape: bf16[2,1024,8], index: 2, kind: input, shape index: {}]   ;;  %s4937_s3 = inlined_call_operand.vmem [shape: bf16[2,1024,8], index: 3, kind: input, shape index: {}]   ;;  %s4938_s4 = inlined_call_operand.vmem [shape: f32[2,8,4], index: 4, kind: input, shape index: {}]   ;;  %s4939_s5 = inlined_call_operand.vmem [shape: f32[2,8,4], index: 5, kind: input, shape index: {}]   ;;  %s4940_s6 = inlined_call_operand.vmem [shape: f32[2,4,8], index: 6, kind: input, shape index: {}]   ;;  %s4941_s7 = inlined_call_operand.vmem [shape: f32[2,4,8], index: 7, kind: input, shape index: {}]   ;;  %s4942_s8 = inlined_call_operand.vmem [shape: f32[2,4,8], index: 8, kind: input, shape index: {}]   ;;  %s4943_s9 = inlined_call_operand.vmem [shape: f32[2,1,8], index: 9, kind: input, shape index: {}]   ;;  %s4944_s10 = inlined_call_operand.hbm [shape: f32[2,8,8], index: 10, kind: output, shape index: {}]  }
   0x1   :  { %4946 = sst [smem:[#allocation5_spill]] %s4934_s0 }
   0x2   :  { %15 = vsyncpa [#allocation3], 0 }
   0x3   :  { %17 = vsyncpa [#allocation3 + $0x1], 0  ;;  %s4304_s13 = smov 0   ;;  %s4306_s14 = smov 0  }
   0x4   :  { %s4308_s15 = smov 0   ;;  %s4310_s16 = smov 0  }
   0x5   :  { %s4312_s17 = smov 0   ;;  %s4314_s18 = smov 0  }
   0x6 LB: > { %s3060_s19 = sadd.s32 4294967295, %s4246_s18   ;;  %s3061_s20 = sadd.s32 4294967294, %s4246_s18   ;;  %s4246_s18 = sphi %s4314_s18, %s23_s18   ;;  %s4242_s17 = sphi %s4312_s17, %s4959_s17   ;;  %s4238_s16 = sphi %s4310_s16, %s4958_s16   ;;  %s4234_s15 = sphi %s4308_s15, %s4957_s15   ;;  %s4230_s14 = sphi %s4306_s14, %s4956_s14   ;;  %s4226_s13 = sphi %s4304_s13, %s4955_s13  }
   0x7   : > { %s42_s21 = sadd.s32 1, %s4242_s17  ;;  %s325_s22 = sadd.s32 1, %s4234_s15 }
   0x8   : > { %p44_p0 = scmp.ge.s32.totalorder %s42_s21, 2  ;;  %p335_p1 = scmp.ne.s32.totalorder %s4234_s15, %s4230_s14 }
   0x9   : > { %p336_p2 = scmp.eq.s32.totalorder %s3060_s19, 1  ;;  %p341_p3 = scmp.ne.s32.totalorder %s4230_s14, %s4226_s13 }
   0xa   : > { %s4961_s21 = smov (%p44_p0, %s42_s21), 0  ;;  %p342_p5 = scmp.eq.s32.totalorder %s3061_s20, 1 }
   0xb   : > { %p4344_p4 = por %p336_p2, %p335_p1  ;;  %s320_s24 = ssub.s32 %s4242_s17, %s4961_s21 }
   0xc   : > { %p3064_p6 = scmp.ge.s32.totalorder %s4246_s18, 1  ;;  %p323_p7 = scmp.eq.s32.totalorder %s320_s24, 0 }
   0xd   : > { %p4351_p8 = por %p342_p5, %p341_p3  ;;  %p463_p9 = scmp.lt.s32.totalorder %s4246_s18, 3 }
   0xe   : > { %s4357_s26 = scalar_select %p323_p7, %s4234_s15, %s325_s22  }
   0xf   : > { %p464_p10 = pnand %p3064_p6, %p463_p9 }
  0x10   : > { %p566_p11 = scmp.lt.s32.totalorder (!%p464_p10), %s4238_s16, 1  ;;  %s4949_s0 = sld [smem:[#allocation5_spill]] (!%p464_p10) }
  0x11   : > { %467 = sbr.rel (%p464_p10) target bundleno = 377 (0x179), region = 60 }
  0x16   : > { %s4361_s27 = scalar_select %p566_p11, %s4238_s16, 1  ;;  %vm2746_vm8 = vcmask 1043456  }
  0x18   : > { %s4364_s28 = sshll.u32 %s4361_s27, 9  ;;  %s3859_s12 = sshll.u32 %s4361_s27, 5 }
  0x19   : > { %s4370_s11 = scalar_lea.vmem %s4936_s2, %s4364_s28  ;;  %s577_s22 = scalar_lea.vmem %s4949_s0, %s3859_s12 }
  0x1a   : > { %v3934_v0 = vld [vmem:[%s4370_s11 + $0x38] sm:$0xff]  ;;  %v3933_v4 = vld [vmem:[%s4370_s11 + $0x30] sm:$0xff]  ;;  %v3932_v8 = vld [vmem:[%s4370_s11 + $0x28] sm:$0xff]  ;;  %s4545_s30 = scalar_lea.vmem %s4935_s1, %s4364_s28  ;;  %s4698_s19 = scalar_lea.vmem %s4937_s3, %s4364_s28 }
  0x1b   : > { %v3942_v1 = vld [vmem:[%s4370_s11 + $0x78] sm:$0xff]  ;;  %1481 = vmatpush.bf16.msra.mxu0 %v3934_v0  ;;  %v3941_v5 = vld [vmem:[%s4370_s11 + $0x70] sm:$0xff]  ;;  %v3940_v9 = vld [vmem:[%s4370_s11 + $0x68] sm:$0xff]  ;;  %s3074_s28 = sshll.u32 %s4361_s27, 3  ;;  %s4817_s12 = sshll.u32 %s4361_s27, 2 }
  0x1c   : > { %v3950_v2 = vld [vmem:[%s4370_s11 + $0xb8] sm:$0xff]  ;;  %1494 = vmatpush.bf16.msra.mxu1 %v3942_v1  ;;  %v3949_v6 = vld [vmem:[%s4370_s11 + $0xb0] sm:$0xff]  ;;  %v3948_v10 = vld [vmem:[%s4370_s11 + $0xa8] sm:$0xff]  ;;  %s622_s24 = scalar_lea.vmem %s4939_s5, %s3074_s28  ;;  %s630_s20 = scalar_lea.vmem %s4941_s7, %s4817_s12 }
  0x1d   : > { %v3958_v3 = vld [vmem:[%s4370_s11 + $0xf8] sm:$0xff]  ;;  %1507 = vmatpush.bf16.msra.mxu2 %v3950_v2  ;;  %v3957_v7 = vld [vmem:[%s4370_s11 + $0xf0] sm:$0xff]  ;;  %v3956_v11 = vld [vmem:[%s4370_s11 + $0xe8] sm:$0xff] }
  0x1e   : > { %1520 = vmatpush.bf16.msra.mxu3 %v3958_v3  ;;  %v3931_v12 = vld [vmem:[%s4370_s11 + $0x20] sm:$0xff]  ;;  %v3930_v16 = vld [vmem:[%s4370_s11 + $0x18] sm:$0xff]  ;;  %v3929_v20 = vld [vmem:[%s4370_s11 + $0x10] sm:$0xff] }
  0x1f   : > { %1482 = vmatpush.bf16.msra.mxu0 %v3933_v4  ;;  %v3939_v13 = vld [vmem:[%s4370_s11 + $0x60] sm:$0xff]  ;;  %v3938_v17 = vld [vmem:[%s4370_s11 + $0x58] sm:$0xff]  ;;  %v645_v21 = vld [vmem:[%s577_s22 + $0x8] sm:$0xff] }
  0x20   : > { %1495 = vmatpush.bf16.msra.mxu1 %v3941_v5  ;;  %v3947_v14 = vld [vmem:[%s4370_s11 + $0xa0] sm:$0xff]  ;;  %v3946_v18 = vld [vmem:[%s4370_s11 + $0x98] sm:$0xff]  ;;  %v3937_v22 = vld [vmem:[%s4370_s11 + $0x50] sm:$0xff]  ;;  %v4398_v23 = vunpack.c.l.bf16 %v645_v21  ;;  %v4400_v25 = vunpack.c.h.bf16 %v645_v21 }
  0x21   : > { %1508 = vmatpush.bf16.msra.mxu2 %v3949_v6  ;;  %v3955_v15 = vld [vmem:[%s4370_s11 + $0xe0] sm:$0xff]  ;;  %v3954_v19 = vld [vmem:[%s4370_s11 + $0xd8] sm:$0xff]  ;;  %v3945_v27 = vld [vmem:[%s4370_s11 + $0x90] sm:$0xff] }
  0x22   : > { %1521 = vmatpush.bf16.msra.mxu3 %v3957_v7  ;;  %v644_v24 = vld [vmem:[%s577_s22] sm:$0xff]  ;;  %v647_v26 = vld [vmem:[%s577_s22 + $0x18] sm:$0xff]  ;;  %v3953_v28 = vld [vmem:[%s4370_s11 + $0xd0] sm:$0xff]  ;;  %v658_v32 = vand.u32 2147483647, %v4398_v23  ;;  %vm706_vm0 = vcmp.ge.f32.partialorder %v4398_v23, 0.0 }
  0x23   : > { %1483 = vmatpush.bf16.msra.mxu0 %v3932_v8  ;;  %v4404_v29 = vunpack.c.l.bf16 %v644_v24  ;;  %v4406_v30 = vunpack.c.h.bf16 %v644_v24  ;;  %v646_v31 = vld [vmem:[%s577_s22 + $0x10] sm:$0xff]  ;;  %v659_v33 = vand.u32 2147483647, %v4400_v25  ;;  %v4411_v35 = vunpack.c.l.bf16 %v647_v26  ;;  %v3928_v36 = vld [vmem:[%s4370_s11 + $0x8] sm:$0xff]  ;;  %v3927_v50 = vld [vmem:[%s4370_s11] sm:$0xff]  ;;  %s634_s22 = scalar_lea.vmem %s4942_s8, %s4817_s12 }
  0x24   : > { %1496 = vmatpush.bf16.msra.mxu1 %v3940_v9  ;;  %v3936_v37 = vld [vmem:[%s4370_s11 + $0x48] sm:$0xff]  ;;  %v666_v38 = vsub.f32 0.0, %v658_v32  ;;  %v4416_v41 = vunpack.c.l.bf16 %v646_v31  ;;  %v4420_v45 = vunpack.c.h.bf16 %v647_v26  ;;  %v4422_v46 = vunpack.c.h.bf16 %v646_v31  ;;  %v3935_v51 = vld [vmem:[%s4370_s11 + $0x40] sm:$0xff]  ;;  %v3966_v61 = vld [vmem:[%s4370_s11 + $0x138] sm:$0xff] }
  0x25   : > { %1509 = vmatpush.bf16.msra.mxu2 %v3948_v10  ;;  %v656_v34 = vand.u32 2147483647, %v4404_v29  ;;  %v667_v39 = vsub.f32 0.0, %v659_v33  ;;  %v657_v40 = vand.u32 2147483647, %v4406_v30  ;;  %v3944_v42 = vld [vmem:[%s4370_s11 + $0x88] sm:$0xff] }
  0x26   : > { %1522 = vmatpush.bf16.msra.mxu3 %v3956_v11  ;;  %v3952_v43 = vld [vmem:[%s4370_s11 + $0xc8] sm:$0xff]  ;;  %v676_v47 = vmul.f32 1.442695, %v666_v38  ;;  %v662_v53 = vand.u32 2147483647, %v4411_v35  ;;  %v3943_v57 = vld [vmem:[%s4370_s11 + $0x80] sm:$0xff] }
  0x27   : > { %1484 = vmatpush.bf16.msra.mxu0 %v3931_v12  ;;  %v664_v44 = vsub.f32 0.0, %v656_v34  ;;  %v678_v48 = vmul.f32 1.442695, %v667_v39  ;;  %v665_v49 = vsub.f32 0.0, %v657_v40  ;;  %v660_v55 = vand.u32 2147483647, %v4416_v41 }
  0x28   : > { %1497 = vmatpush.bf16.msra.mxu1 %v3939_v13  ;;  %4112 = vpow2.f32 %v676_v47  ;;  %v663_v56 = vand.u32 2147483647, %v4420_v45  ;;  %v3951_v58 = vld [vmem:[%s4370_s11 + $0xc0] sm:$0xff]  ;;  %v670_v59 = vsub.f32 0.0, %v662_v53  ;;  %v661_v60 = vand.u32 2147483647, %v4422_v46 }
  0x29   : > { %1510 = vmatpush.bf16.msra.mxu2 %v3947_v14  ;;  %v672_v52 = vmul.f32 1.442695, %v664_v44  ;;  %v674_v54 = vmul.f32 1.442695, %v665_v49  ;;  %v3974_v62 = vld [vmem:[%s4370_s11 + $0x178] sm:$0xff]  ;;  %v668_v63 = vsub.f32 0.0, %v660_v55 }
  0x2a   : > { %1523 = vmatpush.bf16.msra.mxu3 %v3955_v15  ;;  %v671_v0 = vsub.f32 0.0, %v663_v56  ;;  %v3982_v1 = vld [vmem:[%s4370_s11 + $0x1b8] sm:$0xff]  ;;  %v684_v3 = vmul.f32 1.442695, %v670_v59  ;;  %v669_v5 = vsub.f32 0.0, %v661_v60  ;;  %v3965_v8 = vld [vmem:[%s4370_s11 + $0x130] sm:$0xff] }
  0x2b   : > { %1485 = vmatpush.bf16.msra.mxu0 %v3930_v16  ;;  %4114 = vpow2.f32 %v672_v52  ;;  %v3990_v2 = vld [vmem:[%s4370_s11 + $0x1f8] sm:$0xff]  ;;  %v680_v4 = vmul.f32 1.442695, %v668_v63  ;;  %v3973_v9 = vld [vmem:[%s4370_s11 + $0x170] sm:$0xff]  ;;  %v3988_v24 = vld [vmem:[%s4370_s11 + $0x1e8] sm:$0xff]  ;;  %vm704_vm1 = vcmp.ge.f32.partialorder %v4404_v29, 0.0 }
  0x2c   : > { %1498 = vmatpush.bf16.msra.mxu1 %v3938_v17  ;;  %4116 = vpow2.f32 %v678_v48  ;;  %v686_v6 = vmul.f32 1.442695, %v671_v0  ;;  %v3981_v11 = vld [vmem:[%s4370_s11 + $0x1b0] sm:$0xff]  ;;  %v682_v16 = vmul.f32 1.442695, %v669_v5  ;;  %v3963_v31 = vld [vmem:[%s4370_s11 + $0x120] sm:$0xff] }
  0x2d   : > { %1511 = vmatpush.bf16.msra.mxu2 %v3946_v18  ;;  %4118 = vpow2.f32 %v674_v54  ;;  %v3989_v12 = vld [vmem:[%s4370_s11 + $0x1f0] sm:$0xff]  ;;  %v3971_v32 = vld [vmem:[%s4370_s11 + $0x160] sm:$0xff]  ;;  %v3962_v44 = vld [vmem:[%s4370_s11 + $0x118] sm:$0xff]  ;;  %vm707_vm2 = vcmp.ge.f32.partialorder %v4400_v25, 0.0  ;;  %vm705_vm3 = vcmp.ge.f32.partialorder %v4406_v30, 0.0  ;;  %vm710_vm4 = vcmp.ge.f32.partialorder %v4411_v35, 0.0 }
  0x2e   : > { %1524 = vmatpush.bf16.msra.mxu3 %v3954_v19  ;;  %4120 = vpow2.f32 %v684_v3  ;;  %v4113_v7 = vpop.eup %4112  ;;  %v3964_v19 = vld [vmem:[%s4370_s11 + $0x128] sm:$0xff]  ;;  %v3970_v47 = vld [vmem:[%s4370_s11 + $0x158] sm:$0xff]  ;;  %v3969_v59 = vld [vmem:[%s4370_s11 + $0x150] sm:$0xff]  ;;  %vm708_vm5 = vcmp.ge.f32.partialorder %v4416_v41, 0.0  ;;  %vm711_vm6 = vcmp.ge.f32.partialorder %v4420_v45, 0.0  ;;  %vm709_vm7 = vcmp.ge.f32.partialorder %v4422_v46, 0.0 }
  0x2f   : > { %1486 = vmatpush.bf16.msra.mxu0 %v3929_v20  ;;  %4122 = vpow2.f32 %v680_v4  ;;  %v4440_v13 = vadd.f32 1.0, %v4113_v7  ;;  %v3972_v20 = vld [vmem:[%s4370_s11 + $0x168] sm:$0xff]  ;;  %v3986_v52 = vld [vmem:[%s4370_s11 + $0x1d8] sm:$0xff]  ;;  %v3977_v63 = vld [vmem:[%s4370_s11 + $0x190] sm:$0xff] }
  0x30   : > { %1499 = vmatpush.bf16.msra.mxu1 %v3937_v22  ;;  %4124 = vpow2.f32 %v686_v6  ;;  %v3980_v22 = vld [vmem:[%s4370_s11 + $0x1a8] sm:$0xff]  ;;  %v3985_v0 = vld [vmem:[%s4370_s11 + $0x1d0] sm:$0xff] }
  0x31   : > { %1512 = vmatpush.bf16.msra.mxu2 %v3945_v27  ;;  %v4115_v10 = vpop.eup %4114  ;;  %4126 = vrcp.f32 %v4440_v13 }
  0x32   : > { %1525 = vmatpush.bf16.msra.mxu3 %v3953_v28  ;;  %v4117_v14 = vpop.eup %4116  ;;  %v4442_v15 = vadd.f32 1.0, %v4115_v10 }
  0x33   : > { %1487 = vmatpush.bf16.msra.mxu0 %v3928_v36  ;;  %v4444_v17 = vpop.eup %4118  ;;  %v4447_v18 = vadd.f32 1.0, %v4117_v14  ;;  %v3979_v36 = vld [vmem:[%s4370_s11 + $0x1a0] sm:$0xff] }
  0x34   : > { %1500 = vmatpush.bf16.msra.mxu1 %v3936_v37  ;;  %v4451_v21 = vpop.eup %4120  ;;  %4128 = vrcp.f32 %v4442_v15  ;;  %v4459_v27 = vadd.f32 1.0, %v4444_v17  ;;  %v3987_v37 = vld [vmem:[%s4370_s11 + $0x1e0] sm:$0xff] }
  0x35   : > { %1513 = vmatpush.bf16.msra.mxu2 %v3944_v42  ;;  %v4456_v26 = vpop.eup %4122  ;;  %4130 = vpow2.f32 %v682_v16  ;;  %v4467_v33 = vadd.f32 1.0, %v4451_v21  ;;  %v3984_v16 = vld [vmem:[%s4370_s11 + $0x1c8] sm:$0xff] }
  0x36   : > { %1526 = vmatpush.bf16.msra.mxu3 %v3952_v43  ;;  %v4461_v28 = vpop.eup %4124  ;;  %4132 = vrcp.f32 %v4447_v18  ;;  %v4473_v38 = vadd.f32 1.0, %v4456_v26 }
  0x37   : > { %1488 = vmatpush.bf16.msra.mxu0 %v3927_v50  ;;  %v4127_v34 = vpop.eup %4126  ;;  %4134 = vrcp.f32 %v4459_v27  ;;  %v4477_v40 = vadd.f32 1.0, %v4461_v28 }
  0x38   : > { %1501 = vmatpush.bf16.msra.mxu1 %v3935_v51  ;;  %v714_v39 = vmul.f32 %v4127_v34, %v4113_v7  ;;  %4136 = vrcp.f32 %v4467_v33  ;;  %v3978_v51 = vld [vmem:[%s4370_s11 + $0x198] sm:$0xff] }
  0x39   : > { %1514 = vmatpush.bf16.msra.mxu2 %v3943_v57  ;;  %4138 = vrcp.f32 %v4473_v38 }
  0x3a   : > { %1527 = vmatpush.bf16.msra.mxu3 %v3951_v58  ;;  %v4129_v42 = vpop.eup %4128  ;;  %v4484_v48 = vsel %vm706_vm0, %v4127_v34, %v714_v39  ;;  %4140 = vrcp.f32 %v4477_v40  ;;  %v3961_v58 = vld [vmem:[%s4370_s11 + $0x110] sm:$0xff]  ;;  %v3975_v34 = vld [vmem:[%s4370_s11 + $0x180] sm:$0xff] }
  0x3b   : > { %1533 = vmatpush.bf16.msrb.mxu0 %v3966_v61  ;;  %v4480_v43 = vpop.eup %4130  ;;  %v712_v49 = vmul.f32 %v4129_v42, %v4115_v10  ;;  %v4491_v53 = vmul.f32 %v4484_v48, %v4484_v48  ;;  %v3960_v10 = vld [vmem:[%s4370_s11 + $0x108] sm:$0xff]  ;;  %v3983_v39 = vld [vmem:[%s4370_s11 + $0x1c0] sm:$0xff] }
  0x3c   : > { %1546 = vmatpush.bf16.msrb.mxu1 %v3974_v62  ;;  %v4133_v50 = vpop.eup %4132  ;;  %v4511_v62 = vadd.f32 1.0, %v4480_v43 }
  0x3d   : > { %1559 = vmatpush.bf16.msrb.mxu2 %v3982_v1  ;;  %v4497_v54 = vsel %vm704_vm1, %v4129_v42, %v712_v49  ;;  %v715_v55 = vmul.f32 %v4133_v50, %v4117_v14  ;;  %v794_v56 = vmul.f32 %v4491_v53, %v4398_v23  ;;  %v4135_v57 = vpop.eup %4134  ;;  %v3976_v14 = vld [vmem:[%s4370_s11 + $0x188] sm:$0xff]  ;;  %v3870_v42 = vld [vmem:[%s4545_s30 + $0x38] sm:$0xff]  ;;  %vm2742_vm1 = vcmask 31744  }
  0x3e   : > { %1572 = vmatpush.bf16.msrb.mxu3 %v3990_v2  ;;  %v4506_v60 = vmul.f32 %v4497_v54, %v4497_v54  ;;  %v4137_v3 = vpop.eup %4136  ;;  %v713_v7 = vmul.f32 %v4135_v57, %v4444_v17  ;;  %4142 = vrcp.f32 %v4511_v62  ;;  %v3878_v49 = vld [vmem:[%s4545_s30 + $0x78] sm:$0xff] }
  0x3f   : > { %1534 = vmatpush.bf16.msrb.mxu0 %v3965_v8  ;;  %v4508_v61 = vsel %vm707_vm2, %v4133_v50, %v715_v55  ;;  %v802_v1 = vpack.c.bf16 %v794_v56, %v794_v56  ;;  %v4139_v5 = vpop.eup %4138  ;;  %v3886_v50 = vld [vmem:[%s4545_s30 + $0xb8] sm:$0xff]  ;;  %4144 = vlog2.f32 %v4440_v13  ;;  %v3875_v13 = vld [vmem:[%s4545_s30 + $0x60] sm:$0xff]  ;;  %vm642_vm2 = vcmask 64512  }
  0x40   : > { %1547 = vmatpush.bf16.msrb.mxu1 %v3973_v9  ;;  %v4517_v2 = vmul.f32 %v4508_v61, %v4508_v61  ;;  %v792_v4 = vmul.f32 %v4506_v60, %v4404_v29  ;;  %v4141_v8 = vpop.eup %4140  ;;  %4146 = vlog2.f32 %v4442_v15 }
  0x41   : > { %1560 = vmatpush.bf16.msrb.mxu2 %v3981_v11  ;;  %v3968_v11 = vld [vmem:[%s4370_s11 + $0x148] sm:$0xff]  ;;  %4148 = vlog2.f32 %v4459_v27 }
  0x42   : > { %1573 = vmatpush.bf16.msrb.mxu3 %v3989_v12  ;;  %1515 = vmatmul.bf16.vlgmr.msra.gmra.mxu2 %v802_v1  ;;  %v795_v6 = vmul.f32 %v4517_v2, %v4400_v25  ;;  %v800_v9 = vpack.c.bf16 %v792_v4, %v792_v4  ;;  %4150 = vlog2.f32 %v4447_v18  ;;  %v3874_v18 = vld [vmem:[%s4545_s30 + $0x58] sm:$0xff] }
  0x43   : > { %1535 = vmatpush.bf16.msrb.mxu0 %v3964_v19  ;;  %v4532_v19 = vsel %vm705_vm3, %v4135_v57, %v713_v7  ;;  %v3876_v7 = vld [vmem:[%s4545_s30 + $0x68] sm:$0xff]  ;;  %4152 = vlog2.f32 %v4473_v38 }
  0x44   : > { %1548 = vmatpush.bf16.msrb.mxu1 %v3972_v20  ;;  %v803_v12 = vpack.c.bf16 %v795_v6, %v795_v6  ;;  %1489 = vmatmul.bf16.vlgmr.msra.gmra.mxu0 %v800_v9  ;;  %v4536_v17 = vmul.f32 %v4532_v19, %v4532_v19  ;;  %v718_v20 = vmul.f32 %v4137_v3, %v4451_v21  ;;  %v3868_v6 = vld [vmem:[%s4545_s30 + $0x28] sm:$0xff]  ;;  %4154 = vlog2.f32 %v4467_v33  ;;  %v3898_v33 = vld [vmem:[%s4545_s30 + $0x118] sm:$0xff] }
  0x45   : > { %1561 = vmatpush.bf16.msrb.mxu2 %v3980_v22  ;;  %v716_v22 = vmul.f32 %v4139_v5, %v4456_v26  ;;  %v3892_v9 = vld [vmem:[%s4545_s30 + $0xe8] sm:$0xff]  ;;  %4156 = vlog2.f32 %v4511_v62  ;;  %v3914_v62 = vld [vmem:[%s4545_s30 + $0x198] sm:$0xff] }
  0x46   : > { %1574 = vmatpush.bf16.msrb.mxu3 %v3988_v24  ;;  %v719_v24 = vmul.f32 %v4141_v8, %v4461_v28  ;;  %v793_v21 = vmul.f32 %v4536_v17, %v4406_v30  ;;  %v4557_v26 = vsel %vm710_vm4, %v4137_v3, %v718_v20  ;;  %v4143_v28 = vpop.eup %4142  ;;  %4158 = vlog2.f32 %v4477_v40  ;;  %v3897_v40 = vld [vmem:[%s4545_s30 + $0x110] sm:$0xff] }
  0x47   : > { %1536 = vmatpush.bf16.msrb.mxu0 %v3963_v31  ;;  %1528 = vmatmul.bf16.vlgmr.msra.gmra.mxu3 %v803_v12  ;;  %v3959_v31 = vld [vmem:[%s4370_s11 + $0x100] sm:$0xff]  ;;  %v717_v56 = vmul.f32 %v4143_v28, %v4480_v43  ;;  %v3893_v43 = vld [vmem:[%s4545_s30 + $0xf0] sm:$0xff]  ;;  %v4145_v15 = vpop.eup %4144 }
  0x48   : > { %1549 = vmatpush.bf16.msrb.mxu1 %v3971_v32  ;;  %v3967_v32 = vld [vmem:[%s4370_s11 + $0x140] sm:$0xff]  ;;  %v4147_v27 = vpop.eup %4146  ;;  %s615_s11 = scalar_lea.vmem %s4938_s4, %s3074_s28 }
  0x49   : > { %1562 = vmatpush.bf16.msrb.mxu2 %v3979_v36  ;;  %v4559_v36 = vsel %vm708_vm5, %v4139_v5, %v716_v22  ;;  %v3891_v22 = vld [vmem:[%s4545_s30 + $0xe0] sm:$0xff] }
  0x4a   : > { %1575 = vmatpush.bf16.msrb.mxu3 %v3987_v37  ;;  %v801_v37 = vpack.c.bf16 %v793_v21, %v793_v21  ;;  %v4579_v55 = vmul.f32 %v4559_v36, %v4559_v36  ;;  %v3882_v21 = vld [vmem:[%s4545_s30 + $0x98] sm:$0xff] }
  0x4b   : > { %1537 = vmatpush.bf16.msrb.mxu0 %v3962_v44  ;;  %v4565_v44 = vmul.f32 %v4557_v26, %v4557_v26 }
  0x4c   : > { %1550 = vmatpush.bf16.msrb.mxu1 %v3970_v47  ;;  %v4569_v47 = vsel %vm711_vm6, %v4141_v8, %v719_v24  ;;  %v796_v3 = vmul.f32 %v4579_v55, %v4416_v41  ;;  %v3884_v8 = vld [vmem:[%s4545_s30 + $0xa8] sm:$0xff]  ;;  %v3866_v24 = vld [vmem:[%s4545_s30 + $0x18] sm:$0xff] }
  0x4d   : > { %1563 = vmatpush.bf16.msrb.mxu2 %v3978_v51  ;;  %1502 = vmatmul.bf16.vlgmr.msra.gmra.mxu1 %v801_v37  ;;  %v3894_v51 = vld [vmem:[%s4545_s30 + $0xf8] sm:$0xff]  ;;  %v4584_v57 = vmul.f32 %v4569_v47, %v4569_v47  ;;  %v728_v37 = vmax.f32 %v4404_v29, 0.0 }
  0x4e   : > { %1576 = vmatpush.bf16.msrb.mxu3 %v3986_v52  ;;  %v798_v52 = vmul.f32 %v4565_v44, %v4411_v35 }
  0x4f   : > { %1538 = vmatpush.bf16.msrb.mxu0 %v3961_v58  ;;  %v3869_v58 = vld [vmem:[%s4545_s30 + $0x30] sm:$0xff]  ;;  %v799_v5 = vmul.f32 %v4584_v57, %v4420_v45 }
  0x50   : > { %1551 = vmatpush.bf16.msrb.mxu1 %v3969_v59  ;;  %v4587_v59 = vsel %vm709_vm7, %v4143_v28, %v717_v56  ;;  %v806_v1 = vpack.c.bf16 %v798_v52, %v798_v52  ;;  %v730_v28 = vmax.f32 %v4398_v23, 0.0  ;;  %v3873_v52 = vld [vmem:[%s4545_s30 + $0x50] sm:$0xff] }
  0x51   : > { %1564 = vmatpush.bf16.msrb.mxu2 %v3977_v63  ;;  %v3877_v63 = vld [vmem:[%s4545_s30 + $0x70] sm:$0xff]  ;;  %v4596_v4 = vmul.f32 %v4587_v59, %v4587_v59  ;;  %v807_v12 = vpack.c.bf16 %v799_v5, %v799_v5 }
  0x52   : > { %1577 = vmatpush.bf16.msrb.mxu3 %v3985_v0  ;;  %v3885_v0 = vld [vmem:[%s4545_s30 + $0xb0] sm:$0xff] }
  0x53   : > { %1539 = vmatpush.bf16.msrb.mxu0 %v3960_v10  ;;  %v804_v10 = vpack.c.bf16 %v796_v3, %v796_v3  ;;  %v3881_v56 = vld [vmem:[%s4545_s30 + $0x90] sm:$0xff] }
  0x54   : > { %1552 = vmatpush.bf16.msrb.mxu1 %v3968_v11  ;;  %v797_v11 = vmul.f32 %v4596_v4, %v4422_v46 }
  0x55   : > { %1565 = vmatpush.bf16.msrb.mxu2 %v3976_v14  ;;  %v3867_v14 = vld [vmem:[%s4545_s30 + $0x20] sm:$0xff] }
  0x56   : > { %1578 = vmatpush.bf16.msrb.mxu3 %v3984_v16  ;;  %v3883_v16 = vld [vmem:[%s4545_s30 + $0xa0] sm:$0xff]  ;;  %v805_v20 = vpack.c.bf16 %v797_v11, %v797_v11 }
  0x57   : > { %1540 = vmatpush.bf16.msrb.mxu0 %v3959_v31  ;;  %v4149_v31 = vpop.eup %4148  ;;  %v3863_v11 = vld [vmem:[%s4545_s30] sm:$0xff] }
  0x58   : > { %1553 = vmatpush.bf16.msrb.mxu1 %v3967_v32  ;;  %v3890_v32 = vld [vmem:[%s4545_s30 + $0xd8] sm:$0xff] }
  0x59   : > { %1566 = vmatpush.bf16.msrb.mxu2 %v3975_v34  ;;  %v4151_v34 = vpop.eup %4150 }
  0x5a   : > { %1579 = vmatpush.bf16.msrb.mxu3 %v3983_v39  ;;  %1541 = vmatmul.bf16.vlgmr.msrb.gmra.mxu0 %v804_v10  ;;  %v737_v39 = vmul.f32 0.6931472, %v4147_v27  ;;  %v4153_v38 = vpop.eup %4152 }
  0x5b   : > { %1969 = vmatpush.bf16.msra.mxu0 %v3870_v42  ;;  %v729_v42 = vmax.f32 %v4406_v30, 0.0 }
  0x5c   : > { %1982 = vmatpush.bf16.msra.mxu1 %v3878_v49  ;;  %1567 = vmatmul.bf16.vlgmr.msrb.gmra.mxu2 %v806_v1  ;;  %v3865_v49 = vld [vmem:[%s4545_s30 + $0x10] sm:$0xff]  ;;  %v3864_v1 = vld [vmem:[%s4545_s30 + $0x8] sm:$0xff] }
  0x5d   : > { %1995 = vmatpush.bf16.msra.mxu2 %v3886_v50  ;;  %1580 = vmatmul.bf16.vlgmr.msrb.gmra.mxu3 %v807_v12  ;;  %v741_v50 = vmul.f32 0.6931472, %v4145_v15  ;;  %v3910_v15 = vld [vmem:[%s4545_s30 + $0x178] sm:$0xff] }
  0x5e   : > { %2008 = vmatpush.bf16.msra.mxu3 %v3894_v51  ;;  %1554 = vmatmul.bf16.vlgmr.msrb.gmra.mxu1 %v805_v20  ;;  %v739_v51 = vmul.f32 0.6931472, %v4149_v31  ;;  %v3909_v31 = vld [vmem:[%s4545_s30 + $0x170] sm:$0xff] }
  0x5f   : > { %1970 = vmatpush.bf16.msra.mxu0 %v3869_v58  ;;  %v731_v58 = vmax.f32 %v4400_v25, 0.0  ;;  %v4629_v3 = vadd.f32 %v741_v50, %v730_v28  ;;  %v3900_v28 = vld [vmem:[%s4545_s30 + $0x128] sm:$0xff]  ;;  %v3907_v50 = vld [vmem:[%s4545_s30 + $0x160] sm:$0xff] }
  0x60   : > { %1983 = vmatpush.bf16.msra.mxu1 %v3877_v63  ;;  %v743_v63 = vmul.f32 0.6931472, %v4151_v34  ;;  %v4631_v5 = vadd.f32 %v739_v51, %v729_v42  ;;  %v3925_v34 = vld [vmem:[%s4545_s30 + $0x1f0] sm:$0xff]  ;;  %v3924_v42 = vld [vmem:[%s4545_s30 + $0x1e8] sm:$0xff]  ;;  %v3915_v51 = vld [vmem:[%s4545_s30 + $0x1a0] sm:$0xff] }
  0x61   : > { %1996 = vmatpush.bf16.msra.mxu2 %v3885_v0  ;;  %v3889_v0 = vld [vmem:[%s4545_s30 + $0xd0] sm:$0xff]  ;;  %v778_v12 = vmul.f32 %v4491_v53, %v4629_v3  ;;  %v3926_v53 = vld [vmem:[%s4545_s30 + $0x1f8] sm:$0xff] }
  0x62   : > { %2009 = vmatpush.bf16.msra.mxu3 %v3893_v43  ;;  %v4626_v43 = vadd.f32 %v737_v39, %v728_v37  ;;  %v3908_v37 = vld [vmem:[%s4545_s30 + $0x168] sm:$0xff] }
  0x63   : > { %1971 = vmatpush.bf16.msra.mxu0 %v3868_v6  ;;  %v3872_v6 = vld [vmem:[%s4545_s30 + $0x48] sm:$0xff] }
  0x64   : > { %1984 = vmatpush.bf16.msra.mxu1 %v3876_v7  ;;  %v3880_v7 = vld [vmem:[%s4545_s30 + $0x88] sm:$0xff]  ;;  %v776_v10 = vmul.f32 %v4506_v60, %v4626_v43  ;;  %v3902_v60 = vld [vmem:[%s4545_s30 + $0x138] sm:$0xff] }
  0x65   : > { %1997 = vmatpush.bf16.msra.mxu2 %v3884_v8  ;;  %v4635_v8 = vadd.f32 %v743_v63, %v731_v58  ;;  %v3916_v39 = vld [vmem:[%s4545_s30 + $0x1a8] sm:$0xff]  ;;  %v3906_v58 = vld [vmem:[%s4545_s30 + $0x158] sm:$0xff] }
  0x66   : > { %2010 = vmatpush.bf16.msra.mxu3 %v3892_v9  ;;  %v3888_v9 = vld [vmem:[%s4545_s30 + $0xc8] sm:$0xff]  ;;  %v784_v27 = vpack.c.bf16 %v776_v10, %v776_v10  ;;  %v745_v10 = vmul.f32 0.6931472, %v4153_v38 }
  0x67   : > { %1972 = vmatpush.bf16.msra.mxu0 %v3867_v14  ;;  %v777_v14 = vmul.f32 %v4536_v17, %v4631_v5  ;;  %v779_v20 = vmul.f32 %v4517_v2, %v4635_v8  ;;  %v786_v17 = vpack.c.bf16 %v778_v12, %v778_v12  ;;  %v3901_v2 = vld [vmem:[%s4545_s30 + $0x130] sm:$0xff] }
  0x68   : > { %1985 = vmatpush.bf16.msra.mxu1 %v3875_v13  ;;  %v3871_v13 = vld [vmem:[%s4545_s30 + $0x40] sm:$0xff] }
  0x69   : > { %1998 = vmatpush.bf16.msra.mxu2 %v3883_v16  ;;  %v3879_v16 = vld [vmem:[%s4545_s30 + $0x80] sm:$0xff] }
  0x6a   : > { %2011 = vmatpush.bf16.msra.mxu3 %v3891_v22  ;;  %v3887_v22 = vld [vmem:[%s4545_s30 + $0xc0] sm:$0xff] }
  0x6b   : > { %1973 = vmatpush.bf16.msra.mxu0 %v3866_v24  ;;  %v3918_v24 = vld [vmem:[%s4545_s30 + $0x1b8] sm:$0xff] }
  0x6c   : > { %1986 = vmatpush.bf16.msra.mxu1 %v3874_v18  ;;  %v785_v18 = vpack.c.bf16 %v777_v14, %v777_v14  ;;  %v733_v14 = vmax.f32 %v4422_v46, 0.0 }
  0x6d   : > { %1999 = vmatpush.bf16.msra.mxu2 %v3882_v21  ;;  %v787_v21 = vpack.c.bf16 %v779_v20, %v779_v20  ;;  %v735_v20 = vmax.f32 %v4420_v45, 0.0 }
  0x6e   : > { %2012 = vmatpush.bf16.msra.mxu3 %v3890_v32  ;;  %v3917_v32 = vld [vmem:[%s4545_s30 + $0x1b0] sm:$0xff] }
  0x6f   : > { %1974 = vmatpush.bf16.msra.mxu0 %v3865_v49  ;;  %v3899_v49 = vld [vmem:[%s4545_s30 + $0x120] sm:$0xff] }
  0x70   : > { %1987 = vmatpush.bf16.msra.mxu1 %v3873_v52  ;;  %v3923_v52 = vld [vmem:[%s4545_s30 + $0x1e0] sm:$0xff] }
  0x71   : > { %2000 = vmatpush.bf16.msra.mxu2 %v3881_v56  ;;  %v4155_v56 = vpop.eup %4154 }
  0x72   : > { %2013 = vmatpush.bf16.msra.mxu3 %v3889_v0  ;;  %v4157_v63 = vpop.eup %4156  ;;  %v3922_v0 = vld [vmem:[%s4545_s30 + $0x1d8] sm:$0xff]  ;;  %v749_v12 = vmul.f32 0.6931472, %v4155_v56  ;;  %v4013_v56 = vld [vmem:[%s4698_s19 + $0xb0] sm:$0xff] }
  0x73   : > { %1975 = vmatpush.bf16.msra.mxu0 %v3864_v1  ;;  %v4159_v1 = vpop.eup %4158 }
  0x74   : > { %1988 = vmatpush.bf16.msra.mxu1 %v3872_v6  ;;  %v3905_v6 = vld [vmem:[%s4545_s30 + $0x150] sm:$0xff] }
  0x75   : > { %2001 = vmatpush.bf16.msra.mxu2 %v3880_v7  ;;  %v3913_v7 = vld [vmem:[%s4545_s30 + $0x190] sm:$0xff] }
  0x76   : > { %2014 = vmatpush.bf16.msra.mxu3 %v3888_v9  ;;  %v732_v9 = vmax.f32 %v4416_v41, 0.0 }
  0x77   : > { %1976 = vmatpush.bf16.msra.mxu0 %v3863_v11  ;;  %v734_v11 = vmax.f32 %v4411_v35, 0.0 }
  0x78   : > { %1989 = vmatpush.bf16.msra.mxu1 %v3871_v13  ;;  %v747_v13 = vmul.f32 0.6931472, %v4157_v63  ;;  %v4004_v63 = vld [vmem:[%s4698_s19 + $0x68] sm:$0xff] }
  0x79   : > { %2002 = vmatpush.bf16.msra.mxu2 %v3879_v16  ;;  %v3921_v16 = vld [vmem:[%s4545_s30 + $0x1d0] sm:$0xff] }
  0x7a   : > { %2015 = vmatpush.bf16.msra.mxu3 %v3887_v22  ;;  %1977 = vmatmul.bf16.vlgmr.msra.gmra.mxu0 %v784_v27  ;;  %v751_v22 = vmul.f32 0.6931472, %v4159_v1  ;;  %v3912_v27 = vld [vmem:[%s4545_s30 + $0x188] sm:$0xff] }
  0x7b   : > { %2021 = vmatpush.bf16.msrb.mxu0 %v3902_v60  ;;  %1990 = vmatmul.bf16.vlgmr.msra.gmra.mxu1 %v785_v18  ;;  %v3896_v60 = vld [vmem:[%s4545_s30 + $0x108] sm:$0xff] }
  0x7c   : > { %2034 = vmatpush.bf16.msrb.mxu1 %v3910_v15  ;;  %2003 = vmatmul.bf16.vlgmr.msra.gmra.mxu2 %v786_v17  ;;  %v4683_v15 = vadd.f32 %v745_v10, %v732_v9  ;;  %v4689_v17 = vadd.f32 %v747_v13, %v733_v14  ;;  %v3920_v18 = vld [vmem:[%s4545_s30 + $0x1c8] sm:$0xff]  ;;  %v4019_v9 = vld [vmem:[%s4698_s19 + $0xe0] sm:$0xff]  ;;  %v3994_v10 = vld [vmem:[%s4698_s19 + $0x18] sm:$0xff]  ;;  %v770_v13 = vsub.f32 1.0, %v4484_v48 }
  0x7d   : > { %2047 = vmatpush.bf16.msrb.mxu2 %v3918_v24  ;;  %2016 = vmatmul.bf16.vlgmr.msra.gmra.mxu3 %v787_v21  ;;  %v3904_v24 = vld [vmem:[%s4545_s30 + $0x148] sm:$0xff]  ;;  %v4692_v21 = vadd.f32 %v751_v22, %v735_v20  ;;  %v4018_v14 = vld [vmem:[%s4698_s19 + $0xd8] sm:$0xff]  ;;  %v3993_v20 = vld [vmem:[%s4698_s19 + $0x10] sm:$0xff]  ;;  %v769_v22 = vsub.f32 1.0, %v4532_v19  ;;  %v810_v19 = vsub.f32 %v4629_v3, %v4398_v23  ;;  %v811_v23 = vsub.f32 %v4635_v8, %v4400_v25 }
  0x7e   : > { %2060 = vmatpush.bf16.msrb.mxu3 %v3926_v53  ;;  %v4687_v53 = vadd.f32 %v749_v12, %v734_v11  ;;  %v4020_v1 = vld [vmem:[%s4698_s19 + $0xe8] sm:$0xff]  ;;  %v4002_v11 = vld [vmem:[%s4698_s19 + $0x58] sm:$0xff]  ;;  %v4009_v48 = vld [vmem:[%s4698_s19 + $0x90] sm:$0xff] }
  0x7f   : > { %2022 = vmatpush.bf16.msrb.mxu0 %v3901_v2  ;;  %v3895_v2 = vld [vmem:[%s4545_s30 + $0x100] sm:$0xff]  ;;  %v4010_v12 = vld [vmem:[%s4698_s19 + $0x98] sm:$0xff] }
  0x80   : > { %2035 = vmatpush.bf16.msrb.mxu1 %v3909_v31  ;;  %v780_v31 = vmul.f32 %v4579_v55, %v4683_v15  ;;  %v4014_v55 = vld [vmem:[%s4698_s19 + $0xb8] sm:$0xff] }
  0x81   : > { %2048 = vmatpush.bf16.msrb.mxu2 %v3917_v32  ;;  %v3903_v32 = vld [vmem:[%s4545_s30 + $0x140] sm:$0xff]  ;;  %v4038_v25 = vld [vmem:[%s4698_s19 + $0x178] sm:$0xff] }
  0x82   : > { %2061 = vmatpush.bf16.msrb.mxu3 %v3925_v34  ;;  %v3911_v34 = vld [vmem:[%s4545_s30 + $0x180] sm:$0xff]  ;;  %v4046_v8 = vld [vmem:[%s4698_s19 + $0x1b8] sm:$0xff] }
  0x83   : > { %2023 = vmatpush.bf16.msrb.mxu0 %v3900_v28  ;;  %v782_v28 = vmul.f32 %v4565_v44, %v4687_v53 }
  0x84   : > { %2036 = vmatpush.bf16.msrb.mxu1 %v3908_v37  ;;  %v781_v37 = vmul.f32 %v4596_v4, %v4689_v17 }
  0x85   : > { %2049 = vmatpush.bf16.msrb.mxu2 %v3916_v39  ;;  %v3919_v39 = vld [vmem:[%s4545_s30 + $0x1c0] sm:$0xff]  ;;  %v790_v44 = vpack.c.bf16 %v782_v28, %v782_v28  ;;  %v4000_v28 = vld [vmem:[%s4698_s19 + $0x48] sm:$0xff]  ;;  %s626_s30 = scalar_lea.vmem %s4940_s6, %s4817_s12 }
  0x86   : > { %2062 = vmatpush.bf16.msrb.mxu3 %v3924_v42  ;;  %v3998_v42 = vld [vmem:[%s4698_s19 + $0x38] sm:$0xff]  ;;  %v789_v38 = vpack.c.bf16 %v781_v37, %v781_v37  ;;  %v808_v37 = vsub.f32 %v4626_v43, %v4404_v29  ;;  %v3999_v29 = vld [vmem:[%s4698_s19 + $0x40] sm:$0xff] }
  0x87   : > { %2024 = vmatpush.bf16.msrb.mxu0 %v3899_v49  ;;  %v783_v49 = vmul.f32 %v4584_v57, %v4692_v21  ;;  %v4005_v57 = vld [vmem:[%s4698_s19 + $0x70] sm:$0xff] }
  0x88   : > { %2037 = vmatpush.bf16.msrb.mxu1 %v3907_v50  ;;  %v4006_v50 = vld [vmem:[%s4698_s19 + $0x78] sm:$0xff] }
  0x89   : > { %2050 = vmatpush.bf16.msrb.mxu2 %v3915_v51  ;;  %v4022_v51 = vld [vmem:[%s4698_s19 + $0xf8] sm:$0xff]  ;;  %v791_v4 = vpack.c.bf16 %v783_v49, %v783_v49 }
  0x8a   : > { %2063 = vmatpush.bf16.msrb.mxu3 %v3923_v52  ;;  %v788_v52 = vpack.c.bf16 %v780_v31, %v780_v31 }
  0x8b   : > { %2025 = vmatpush.bf16.msrb.mxu0 %v3898_v33  ;;  %v3997_v33 = vld [vmem:[%s4698_s19 + $0x30] sm:$0xff] }
  0x8c   : > { %2038 = vmatpush.bf16.msrb.mxu1 %v3906_v58  ;;  %v4021_v58 = vld [vmem:[%s4698_s19 + $0xf0] sm:$0xff] }
  0x8d   : > { %2051 = vmatpush.bf16.msrb.mxu2 %v3914_v62  ;;  %v3996_v62 = vld [vmem:[%s4698_s19 + $0x28] sm:$0xff] }
  0x8e   : > { %2064 = vmatpush.bf16.msrb.mxu3 %v3922_v0  ;;  %v4012_v0 = vld [vmem:[%s4698_s19 + $0xa8] sm:$0xff] }
  0x8f   : > { %2026 = vmatpush.bf16.msrb.mxu0 %v3897_v40  ;;  %v3995_v40 = vld [vmem:[%s4698_s19 + $0x20] sm:$0xff] }
  0x90   : > { %2039 = vmatpush.bf16.msrb.mxu1 %v3905_v6  ;;  %v4003_v6 = vld [vmem:[%s4698_s19 + $0x60] sm:$0xff] }
  0x91   : > { %2052 = vmatpush.bf16.msrb.mxu2 %v3913_v7  ;;  %v4011_v7 = vld [vmem:[%s4698_s19 + $0xa0] sm:$0xff] }
  0x92   : > { %2065 = vmatpush.bf16.msrb.mxu3 %v3921_v16  ;;  %v768_v16 = vsub.f32 1.0, %v4497_v54  ;;  %v771_v54 = vsub.f32 1.0, %v4508_v61  ;;  %v4008_v61 = vld [vmem:[%s4698_s19 + $0x88] sm:$0xff] }
  0x93   : > { %2027 = vmatpush.bf16.msrb.mxu0 %v3896_v60  ;;  %v4001_v60 = vld [vmem:[%s4698_s19 + $0x50] sm:$0xff] }
  0x94   : > { %2040 = vmatpush.bf16.msrb.mxu1 %v3904_v24  ;;  %v4017_v24 = vld [vmem:[%s4698_s19 + $0xd0] sm:$0xff]  ;;  %v816_v31 = vmul.f32 %v768_v16, %v768_v16  ;;  %v819_v49 = vmul.f32 %v771_v54, %v771_v54  ;;  %v4035_v16 = vld [vmem:[%s4698_s19 + $0x160] sm:$0xff]  ;;  %v4042_v54 = vld [vmem:[%s4698_s19 + $0x198] sm:$0xff] }
  0x95   : > { %2053 = vmatpush.bf16.msrb.mxu2 %v3912_v27  ;;  %v2716_v27 = vld [vmem:[%s622_s24] sm:$0xff]  ;;  %s4945_s24 = sand.u32 1, %s4230_s14  }
  0x96   : > { %2066 = vmatpush.bf16.msrb.mxu3 %v3920_v18  ;;  %v2696_v18 = vld [vmem:[%s615_s11] sm:$0xff]  ;;  %v824_v43 = vmul.f32 %v816_v31, %v808_v37  ;;  %v774_v31 = vsub.f32 1.0, %v4557_v26  ;;  %v4049_v37 = vld [vmem:[%s4698_s19 + $0x1d0] sm:$0xff]  ;;  %s3065_s29 = sshll.u32 %s4945_s24, 3  ;;  %s3856_s11 = sshll.u32 %s4238_s16, 3 }
  0x97   : > { %2028 = vmatpush.bf16.msrb.mxu0 %v3895_v2  ;;  %v818_v2 = vmul.f32 %v770_v13, %v770_v13  ;;  %v3847_v3 = vmul.f32 -1.442695, %v2696_v18  ;;  %v4027_v13 = vld [vmem:[%s4698_s19 + $0x120] sm:$0xff]  ;;  %s4954_s16 = sand.u32 1, %s4230_s14  }
  0x98   : > { %2041 = vmatpush.bf16.msrb.mxu1 %v3903_v32  ;;  %v3992_v32 = vld [vmem:[%s4698_s19 + $0x8] sm:$0xff]  ;;  %s2832_s28 = scalar_lea.sflag [#allocation3], %s4954_s16 }
  0x99   : > { %2054 = vmatpush.bf16.msrb.mxu2 %v3911_v34  ;;  %v817_v34 = vmul.f32 %v769_v22, %v769_v22  ;;  %v4051_v22 = vld [vmem:[%s4698_s19 + $0x1e0] sm:$0xff] }
  0x9a   : > { %2067 = vmatpush.bf16.msrb.mxu3 %v3919_v39  ;;  %2029 = vmatmul.bf16.vlgmr.msrb.gmra.mxu0 %v788_v52  ;;  %v809_v39 = vsub.f32 %v4631_v5, %v4406_v30  ;;  %v4007_v30 = vld [vmem:[%s4698_s19 + $0x80] sm:$0xff] }
  0x9b   : > { %2585 = vmatpush.bf16.msra.mxu0 %v3998_v42  ;;  %2042 = vmatmul.bf16.vlgmr.msrb.gmra.mxu1 %v789_v38  ;;  %v3848_v42 = vmul.f32 -1.442695, %v2716_v27  ;;  %v4015_v52 = vld [vmem:[%s4698_s19 + $0xc0] sm:$0xff]  ;;  %v827_v38 = vmul.f32 %v819_v49, %v811_v23  ;;  %v4050_v27 = vld [vmem:[%s4698_s19 + $0x1d8] sm:$0xff]  ;;  %v4024_v49 = vld [vmem:[%s4698_s19 + $0x108] sm:$0xff]  ;;  %v814_v23 = vsub.f32 %v4687_v53, %v4411_v35 }
  0x9c   : > { %2598 = vmatpush.bf16.msra.mxu1 %v4006_v50  ;;  %2055 = vmatmul.bf16.vlgmr.msrb.gmra.mxu2 %v790_v44  ;;  %v4016_v50 = vld [vmem:[%s4698_s19 + $0xc8] sm:$0xff]  ;;  %v825_v5 = vmul.f32 %v817_v34, %v809_v39  ;;  %v4030_v44 = vld [vmem:[%s4698_s19 + $0x138] sm:$0xff]  ;;  %v775_v34 = vsub.f32 1.0, %v4569_v47  ;;  %v812_v47 = vsub.f32 %v4683_v15, %v4416_v41  ;;  %v822_v39 = vmul.f32 %v774_v31, %v774_v31  ;;  %v4023_v53 = vld [vmem:[%s4698_s19 + $0x100] sm:$0xff] }
  0x9d   : > { %2611 = vmatpush.bf16.msra.mxu2 %v4014_v55  ;;  %2068 = vmatmul.bf16.vlgmr.msrb.gmra.mxu3 %v791_v4  ;;  %v3991_v55 = vld [vmem:[%s4698_s19] sm:$0xff]  ;;  %4160 = vpow2.f32 %v3848_v42  ;;  %v4054_v4 = vld [vmem:[%s4698_s19 + $0x1f8] sm:$0xff]  ;;  %v815_v41 = vsub.f32 %v4692_v21, %v4420_v45  ;;  %v4048_v15 = vld [vmem:[%s4698_s19 + $0x1c8] sm:$0xff] }
  0x9e   : > { %2624 = vmatpush.bf16.msra.mxu3 %v4022_v51  ;;  %v826_v51 = vmul.f32 %v818_v2, %v810_v19  ;;  %4162 = vpow2.f32 %v3847_v3  ;;  %v772_v2 = vsub.f32 1.0, %v4559_v36  ;;  %v4025_v19 = vld [vmem:[%s4698_s19 + $0x110] sm:$0xff]  ;;  %v823_v3 = vmul.f32 %v775_v34, %v775_v34  ;;  %v4031_v45 = vld [vmem:[%s4698_s19 + $0x140] sm:$0xff] }
  0x9f   : > { %2586 = vmatpush.bf16.msra.mxu0 %v3997_v33  ;;  %v4039_v21 = vld [vmem:[%s4698_s19 + $0x180] sm:$0xff] }
  0xa0   : > { %2599 = vmatpush.bf16.msra.mxu1 %v4005_v57  ;;  %v834_v33 = vpack.c.bf16 %v826_v51, %v826_v51  ;;  %v832_v57 = vpack.c.bf16 %v824_v43, %v824_v43  ;;  %v4040_v51 = vld [vmem:[%s4698_s19 + $0x188] sm:$0xff]  ;;  %v831_v43 = vmul.f32 %v823_v3, %v815_v41 }
  0xa1   : > { %2612 = vmatpush.bf16.msra.mxu2 %v4013_v56  ;;  %v833_v56 = vpack.c.bf16 %v825_v5, %v825_v5  ;;  %v4047_v5 = vld [vmem:[%s4698_s19 + $0x1c0] sm:$0xff] }
  0xa2   : > { %2625 = vmatpush.bf16.msra.mxu3 %v4021_v58  ;;  %v4029_v58 = vld [vmem:[%s4698_s19 + $0x130] sm:$0xff] }
  0xa3   : > { %2587 = vmatpush.bf16.msra.mxu0 %v3996_v62  ;;  %v835_v62 = vpack.c.bf16 %v827_v38, %v827_v38 }
  0xa4   : > { %2600 = vmatpush.bf16.msra.mxu1 %v4004_v63  ;;  %v4161_v63 = vpop.eup %4160 }
  0xa5   : > { %2613 = vmatpush.bf16.msra.mxu2 %v4012_v0  ;;  %v4037_v0 = vld [vmem:[%s4698_s19 + $0x170] sm:$0xff] }
  0xa6   : > { %2626 = vmatpush.bf16.msra.mxu3 %v4020_v1  ;;  %v4045_v1 = vld [vmem:[%s4698_s19 + $0x1b0] sm:$0xff] }
  0xa7   : > { %2588 = vmatpush.bf16.msra.mxu0 %v3995_v40  ;;  %v4163_v40 = vpop.eup %4162 }
  0xa8   : > { %2601 = vmatpush.bf16.msra.mxu1 %v4003_v6  ;;  %v4053_v6 = vld [vmem:[%s4698_s19 + $0x1f0] sm:$0xff] }
  0xa9   : > { %2614 = vmatpush.bf16.msra.mxu2 %v4011_v7  ;;  %v4028_v7 = vld [vmem:[%s4698_s19 + $0x128] sm:$0xff] }
  0xaa   : > { %2627 = vmatpush.bf16.msra.mxu3 %v4019_v9  ;;  %v4772_v9 = vadd.f32 1.0, %v4161_v63 }
  0xab   : > { %2589 = vmatpush.bf16.msra.mxu0 %v3994_v10  ;;  %v4036_v10 = vld [vmem:[%s4698_s19 + $0x168] sm:$0xff] }
  0xac   : > { %2602 = vmatpush.bf16.msra.mxu1 %v4002_v11  ;;  %v4044_v11 = vld [vmem:[%s4698_s19 + $0x1a8] sm:$0xff]  ;;  %4164 = vrcp.f32 %v4772_v9  ;;  %vm2726_vm9 = vweird.f32 %v4772_v9 }
  0xad   : > { %2615 = vmatpush.bf16.msra.mxu2 %v4010_v12  ;;  %v4776_v12 = vadd.f32 1.0, %v4163_v40 }
  0xae   : > { %2628 = vmatpush.bf16.msra.mxu3 %v4018_v14  ;;  %v4052_v14 = vld [vmem:[%s4698_s19 + $0x1e8] sm:$0xff] }
  0xaf   : > { %2590 = vmatpush.bf16.msra.mxu0 %v3993_v20  ;;  %v4043_v20 = vld [vmem:[%s4698_s19 + $0x1a0] sm:$0xff]  ;;  %4166 = vrcp.f32 %v4776_v12  ;;  %vm2706_vm11 = vweird.f32 %v4776_v12  ;;  %v2712_v63 = vand.u32 2147483648, %v4776_v12 }
  0xb0   : > { %2603 = vmatpush.bf16.msra.mxu1 %v4001_v60  ;;  %v4026_v60 = vld [vmem:[%s4698_s19 + $0x118] sm:$0xff] }
  0xb1   : > { %2616 = vmatpush.bf16.msra.mxu2 %v4009_v48  ;;  %v4034_v48 = vld [vmem:[%s4698_s19 + $0x158] sm:$0xff] }
  0xb2   : > { %2629 = vmatpush.bf16.msra.mxu3 %v4017_v24  ;;  %v4788_v24 = vpop.eup %4164 }
  0xb3   : > { %2591 = vmatpush.bf16.msra.mxu0 %v3992_v32  ;;  %v773_v32 = vsub.f32 1.0, %v4587_v59  ;;  %v2722_v36 = vmul.f32 %v4788_v24, %v4772_v9  ;;  %v820_v59 = vmul.f32 %v772_v2, %v772_v2  ;;  %vm2727_vm10 = vweird.f32 %v4788_v24 }
  0xb4   : > { %2604 = vmatpush.bf16.msra.mxu1 %v4000_v28  ;;  %v4033_v28 = vld [vmem:[%s4698_s19 + $0x150] sm:$0xff]  ;;  %vm4851_vm13 = vmor %vm2726_vm9, %vm2727_vm10 }
  0xb5   : > { %2617 = vmatpush.bf16.msra.mxu2 %v4008_v61  ;;  %v4791_v18 = vpop.eup %4166  ;;  %v4041_v61 = vld [vmem:[%s4698_s19 + $0x190] sm:$0xff]  ;;  %v821_v42 = vmul.f32 %v773_v32, %v773_v32  ;;  %v828_v35 = vmul.f32 %v820_v59, %v812_v47 }
  0xb6   : > { %2630 = vmatpush.bf16.msra.mxu3 %v4016_v50  ;;  %v2702_v26 = vmul.f32 %v4791_v18, %v4776_v12  ;;  %v813_v50 = vsub.f32 %v4689_v17, %v4422_v46  ;;  %v2723_v46 = vsub.f32 1.0, %v2722_v36  ;;  %vm2707_vm12 = vweird.f32 %v4791_v18 }
  0xb7   : > { %2592 = vmatpush.bf16.msra.mxu0 %v3991_v55  ;;  %v4032_v55 = vld [vmem:[%s4698_s19 + $0x148] sm:$0xff]  ;;  %v836_v38 = vpack.c.bf16 %v828_v35, %v828_v35  ;;  %vm4862_vm14 = vmor %vm2706_vm11, %vm2707_vm12  ;;  %s4188_s19 = scalar_lea.hbm %s4944_s10, 16 }
  0xb8   : > { %2605 = vmatpush.bf16.msra.mxu1 %v3999_v29  ;;  %v2703_v17 = vsub.f32 1.0, %v2702_v26  ;;  %v829_v29 = vmul.f32 %v821_v42, %v813_v50 }
  0xb9   : > { %2618 = vmatpush.bf16.msra.mxu2 %v4007_v30  ;;  %v830_v30 = vmul.f32 %v822_v39, %v814_v23 }
  0xba   : > { %2631 = vmatpush.bf16.msra.mxu3 %v4015_v52  ;;  %2593 = vmatmul.bf16.vlgmr.msra.gmra.mxu0 %v832_v57  ;;  %v2724_v52 = vmul.f32 %v4788_v24, %v2723_v46  ;;  %v2740_v57 = vld [vmem:[%s626_s30] sm:$0xf]  ;;  %s4880_s30 = scalar_lea.vmem [#allocation2], %s3065_s29  ;;  %s2843_s29 = scalar_lea.hbm %s4944_s10, %s3856_s11 }
  0xbb   : > { %2637 = vmatpush.bf16.msrb.mxu0 %v4030_v44  ;;  %2606 = vmatmul.bf16.vlgmr.msra.gmra.mxu1 %v833_v56  ;;  %v2704_v44 = vmul.f32 %v4791_v18, %v2703_v17  ;;  %v839_v56 = vpack.c.bf16 %v831_v43, %v831_v43  ;;  %s2845_s24 = sshll.u32 %s4880_s30, 4  ;;  %s2847_s0 = sshll.u32 %s2843_s29, 4  ;;  %s2846_s24 = int_to_ptr.vmem [resolvable:$true] %s2845_s24  ;;  %s2848_s0 = int_to_ptr.hbm [resolvable:$true] %s2847_s0 }
  0xbc   : > { %2650 = vmatpush.bf16.msrb.mxu1 %v4038_v25  ;;  %2619 = vmatmul.bf16.vlgmr.msra.gmra.mxu2 %v834_v33  ;;  %v2796_v25 = vld [vmem:[%s634_s22] sm:$0xf]  ;;  %v838_v33 = vpack.c.bf16 %v830_v30, %v830_v30  ;;  %v2725_v40 = vadd.f32 %v4788_v24, %v2724_v52  ;;  %s637_s22 = scalar_lea.vmem %s4943_s9, %s4361_s27  ;;  %s4182_s27 = sshra.s32 %s2848_s0, 4  ;;  %s4183_s27 = int_to_ptr.hbm [resolvable:$true] %s4182_s27 }
  0xbd   : > { %2663 = vmatpush.bf16.msrb.mxu2 %v4046_v8  ;;  %2632 = vmatmul.bf16.vlgmr.msra.gmra.mxu3 %v835_v62  ;;  %v2732_v62 = vand.u32 2147483648, %v4772_v9  ;;  %p4189_p1 = scmp.lt.s32.totalorder %s4183_s27, %s4944_s10 }
  0xbe   : > { %2676 = vmatpush.bf16.msrb.mxu3 %v4054_v4  ;;  %v837_v4 = vpack.c.bf16 %v829_v29, %v829_v29 }
  0xbf   : > { %2638 = vmatpush.bf16.msrb.mxu0 %v4029_v58  ;;  %v2730_v58 = vand.u32 2147483647, %v4772_v9 }
  0xc0   : > { %2651 = vmatpush.bf16.msrb.mxu1 %v4037_v0  ;;  %v2741_v0 = vld [vmem:[%s630_s20] sm:$0xf] }
  0xc1   : > { %2664 = vmatpush.bf16.msrb.mxu2 %v4045_v1  ;;  %v1490_v8 = vpop.f32.mrf.mxu0  ;;  %vm2731_vm15 = vcmp.eq.f32.partialorder %v2730_v58, 8.507059e+37 }
  0xc2   : > { %2677 = vmatpush.bf16.msrb.mxu3 %v4053_v6 }
  0xc3   : > { %2639 = vmatpush.bf16.msrb.mxu0 %v4028_v7  ;;  %v2705_v7 = vadd.f32 %v4791_v18, %v2704_v44 }
  0xc4   : > { %2652 = vmatpush.bf16.msrb.mxu1 %v4036_v10  ;;  %v2710_v10 = vand.u32 2147483647, %v4776_v12 }
  0xc5   : > { %2665 = vmatpush.bf16.msrb.mxu2 %v4044_v11  ;;  %v1516_v1 = vpop.f32.mrf.mxu2  ;;  %v2709_v12 = vsel %vm4862_vm14, %v4791_v18, %v2705_v7 }
  0xc6   : > { %2678 = vmatpush.bf16.msrb.mxu3 %v4052_v14  ;;  %v2733_v14 = vor.u32 1.1754944e-38, %v2732_v62  ;;  %vm2711_vm0 = vcmp.eq.f32.partialorder %v2710_v10, 8.507059e+37 }
  0xc7   : > { %2640 = vmatpush.bf16.msrb.mxu0 %v4027_v13  ;;  %v2713_v13 = vor.u32 1.1754944e-38, %v2712_v63 }
  0xc8   : > { %2653 = vmatpush.bf16.msrb.mxu1 %v4035_v16 }
  0xc9   : > { %2666 = vmatpush.bf16.msrb.mxu2 %v4043_v20 }
  0xca   : > { %2679 = vmatpush.bf16.msrb.mxu3 %v4051_v22  ;;  %v1503_v9 = vpop.f32.mrf.mxu1  ;;  %v1529_v20 = vpop.f32.mrf.mxu3  ;;  %v2729_v22 = vsel %vm4851_vm13, %v4788_v24, %v2725_v40 }
  0xcb   : > { %2641 = vmatpush.bf16.msrb.mxu0 %v4026_v60  ;;  %v1504_v16 = vadd.f32 %v1503_v9, %v1490_v8  ;;  %v1492_v60 = vpop.f32.mrf.mxu0 }
  0xcc   : > { %2654 = vmatpush.bf16.msrb.mxu1 %v4034_v48 }
  0xcd   : > { %2667 = vmatpush.bf16.msrb.mxu2 %v4042_v54  ;;  %v1517_v48 = vadd.f32 %v1516_v1, %v1504_v16  ;;  %v2734_v54 = vsel %vm2731_vm15, %v2733_v14, %v2729_v22  ;;  %v1518_v31 = vpop.f32.mrf.mxu2 }
  0xce   : > { %2680 = vmatpush.bf16.msrb.mxu3 %v4050_v27  ;;  %v2714_v27 = vsel %vm2711_vm0, %v2713_v13, %v2709_v12  ;;  %v2737_v32 = vmul.f32 %v2734_v54, %v2734_v54 }
  0xcf   : > { %2642 = vmatpush.bf16.msrb.mxu0 %v4025_v19  ;;  %v1530_v2 = vadd.f32 %v1529_v20, %v1517_v48  ;;  %v2736_v19 = vmul.f32 %v2714_v27, %v2714_v27 }
  0xd0   : > { %2655 = vmatpush.bf16.msrb.mxu1 %v4033_v28 }
  0xd1   : > { %2668 = vmatpush.bf16.msrb.mxu2 %v4041_v61  ;;  %v2738_v61 = vadd.f32 %v2737_v32, %v2736_v19 }
  0xd2   : > { %2681 = vmatpush.bf16.msrb.mxu3 %v4049_v37  ;;  %v1505_v34 = vpop.f32.mrf.mxu1  ;;  %v1531_v28 = vpop.f32.mrf.mxu3 }
  0xd3   : > { %2643 = vmatpush.bf16.msrb.mxu0 %v4024_v49 }
  0xd4   : > { %2656 = vmatpush.bf16.msrb.mxu1 %v4032_v55 }
  0xd5   : > { %2669 = vmatpush.bf16.msrb.mxu2 %v4040_v51 }
  0xd6   : > { %2682 = vmatpush.bf16.msrb.mxu3 %v4048_v15 }
  0xd7   : > { %2644 = vmatpush.bf16.msrb.mxu0 %v4023_v53  ;;  %v1542_v37 = vpop.f32.mrf.mxu0 }
  0xd8   : > { %2657 = vmatpush.bf16.msrb.mxu1 %v4031_v45  ;;  %v1543_v24 = vadd.f32 %v1542_v37, %v1530_v2 }
  0xd9   : > { %2670 = vmatpush.bf16.msrb.mxu2 %v4039_v21 }
  0xda   : > { %2683 = vmatpush.bf16.msrb.mxu3 %v4047_v5  ;;  %2645 = vmatmul.bf16.vlgmr.msrb.gmra.mxu0 %v836_v38 }
  0xdb   : > { %2658 = vmatmul.bf16.vlgmr.msrb.gmra.mxu1 %v837_v4  ;;  %3849 = vmatpush.msk.msra.mxu0 %vm2746_vm8, %v2741_v0  ;;  %v1555_v36 = vpop.f32.mrf.mxu1 }
  0xdc   : > { %3851 = vmatpush.msk.msra.mxu1 %vm2746_vm8, %v2740_v57  ;;  %2671 = vmatmul.bf16.vlgmr.msrb.gmra.mxu2 %v838_v33  ;;  %v1556_v26 = vadd.f32 %v1555_v36, %v1543_v24  ;;  %v4248_v57 = vmov 0.0  }
  0xdd   : > { %3853 = vmatpush.msk.msra.mxu2 %vm2746_vm8, %v2796_v25  ;;  %2684 = vmatmul.bf16.vlgmr.msrb.gmra.mxu3 %v839_v56  ;;  %643 = vst.msk [vmem:[%s4880_s30] sm:$0xff] %vm642_vm2, %v4248_v57 }
  0xdf   : > { %v1568_v18 = vpop.f32.mrf.mxu2  ;;  %v1544_v39 = vpop.f32.mrf.mxu0 }
  0xe0   : > { %v1569_v59 = vadd.f32 %v1568_v18, %v1556_v26  ;;  %v1581_v47 = vpop.f32.mrf.mxu3  ;;  %v4111_v18 = vld [vmem:[%s637_s22] ss:$0 sm:$0xff]  ;;  %s4184_s22 = scalar_lea.hbm %s4183_s27, 8 }
  0xe1   : > { %p4185_p12 = scmp.ne.s32.totalorder %s4183_s27, %s4184_s22  ;;  %p4190_p2 = scmp.lt.s32.totalorder %s4188_s19, %s4184_s22 }
  0xe2   : > { %v1582_v42 = vadd.f32 %v1581_v47, %v1569_v59 }
  0xe3   : > { %v1557_v50 = vpop.f32.mrf.mxu1  ;;  %p4186_p13 = pnand %p4185_p12, %p4344_p4  ;;  %p4191_p3 = por %p4190_p2, %p4189_p1 }
  0xe4   : > { %v840_v31 = vld [vmem:[%s4880_s30] sm:$0xff] }
  0xe5   : > { %p4187_p0 = pneg %p4186_p13 }
  0xe7   : > { %v1570_v49 = vpop.f32.mrf.mxu2  ;;  %p4192_p5 = pnand %p4191_p3, %p4187_p0 }
  0xe8   : > { %v1583_v23 = vpop.f32.mrf.mxu3 }
  0xea   : > { %3850 = vmatmul.msk.f32.vlgmr.msra.gmra.mxu0 %vm2742_vm1, %v2714_v27 }
  0xeb   : > { %3852 = vmatmul.msk.f32.vlgmr.msra.gmra.mxu1 %vm2742_vm1, %v2738_v61 }
  0xec   : > { %3854 = vmatmul.msk.f32.vlgmr.msra.gmra.mxu2 %vm2742_vm1, %v2734_v54 }
  0xf7   : > { %v1978_v3 = vpop.f32.mrf.mxu0 }
  0xf8   : > { %v1979_v55 = vadd.f32 %v1978_v3, %v1582_v42  ;;  %v1991_v51 = vpop.f32.mrf.mxu1 }
  0xfa   : > { %v1992_v41 = vadd.f32 %v1991_v51, %v1979_v55 }
  0xff   : > { %v2004_v15 = vpop.f32.mrf.mxu2  ;;  %v1980_v35 = vpop.f32.mrf.mxu0 }
 0x100   : > { %v2005_v46 = vadd.f32 %v2004_v15, %v1992_v41  ;;  %v2017_v17 = vpop.f32.mrf.mxu3  ;;  %v1993_v53 = vpop.f32.mrf.mxu1 }
 0x102   : > { %v2018_v29 = vadd.f32 %v2017_v17, %v2005_v46 }
 0x107   : > { %v2006_v30 = vpop.f32.mrf.mxu2 }
 0x108   : > { %v2019_v45 = vpop.f32.mrf.mxu3 }
 0x117   : > { %v2030_v21 = vpop.f32.mrf.mxu0 }
 0x118   : > { %v2043_v43 = vpop.f32.mrf.mxu1  ;;  %v2031_v7 = vadd.f32 %v2030_v21, %v2018_v29 }
 0x11a   : > { %v2044_v13 = vadd.f32 %v2043_v43, %v2031_v7 }
 0x11f   : > { %v2056_v5 = vpop.f32.mrf.mxu2  ;;  %v2032_v44 = vpop.f32.mrf.mxu0 }
 0x120   : > { %v2069_v52 = vpop.f32.mrf.mxu3  ;;  %v2045_v38 = vpop.f32.mrf.mxu1  ;;  %v2057_v16 = vadd.f32 %v2056_v5, %v2044_v13 }
 0x122   : > { %v2070_v27 = vadd.f32 %v2069_v52, %v2057_v16 }
 0x127   : > { %v2058_v25 = vpop.f32.mrf.mxu2 }
 0x128   : > { %v2071_v8 = vpop.f32.mrf.mxu3 }
 0x137   : > { %v2594_v4 = vpop.f32.mrf.mxu0 }
 0x138   : > { %v2607_v33 = vpop.f32.mrf.mxu1 }
 0x139   : > { %v2608_v40 = vadd.f32 %v2607_v33, %v2594_v4 }
 0x13f   : > { %v2620_v56 = vpop.f32.mrf.mxu2  ;;  %v2596_v62 = vpop.f32.mrf.mxu0 }
 0x140   : > { %v2633_v58 = vpop.f32.mrf.mxu3  ;;  %v2609_v63 = vpop.f32.mrf.mxu1  ;;  %v2621_v6 = vadd.f32 %v2620_v56, %v2608_v40 }
 0x142   : > { %v2634_v10 = vadd.f32 %v2633_v58, %v2621_v6 }
 0x147   : > { %v2622_v0 = vpop.f32.mrf.mxu2 }
 0x148   : > { %v2635_v1 = vpop.f32.mrf.mxu3 }
 0x157   : > { %v2646_v11 = vpop.f32.mrf.mxu0 }
 0x158   : > { %v2659_v9 = vpop.f32.mrf.mxu1  ;;  %v2647_v14 = vadd.f32 %v2646_v11, %v2634_v10 }
 0x15a   : > { %v2660_v20 = vadd.f32 %v2659_v9, %v2647_v14 }
 0x15f   : > { %v2672_v22 = vpop.f32.mrf.mxu2  ;;  %v2648_v48 = vpop.f32.mrf.mxu0 }
 0x160   : > { %v2673_v12 = vadd.f32 %v2672_v22, %v2660_v20  ;;  %v2685_v60 = vpop.f32.mrf.mxu3  ;;  %v2661_v54 = vpop.f32.mrf.mxu1 }
 0x162   : > { %v2686_v2 = vadd.f32 %v2685_v60, %v2673_v12 }
 0x164   : > { %v2689_v32 = vadd.f32 %v2686_v2, %v2070_v27 }
 0x166   : > { %v2690_v19 = vadd.f32 %v2689_v32, %v840_v31 }
 0x167   : > { %v2674_v34 = vpop.f32.mrf.mxu2  ;;  %v2767_v61 = vpop.f32.mrf.mxu0 }
 0x168   : > { %2692 = vst.msk [vmem:[%s4880_s30] sm:$0xff] %vm642_vm2, %v2690_v19  ;;  %v2687_v28 = vpop.f32.mrf.mxu3  ;;  %v2793_v37 = vpop.f32.mrf.mxu1 }
 0x169   : > { %v2794_v24 = vadd.f32 %v2793_v37, %v2767_v61 }
 0x16f   : > { %v2820_v36 = vpop.f32.mrf.mxu2  ;;  %v2739_v47 = vld [vmem:[%s4880_s30] sm:$0xff] }
 0x170   : > { %v2823_v26 = vadd.f32 %v2820_v36, %v2794_v24 }
 0x172   : > { %v2828_v59 = vadd.f32 %v4111_v18, %v2823_v26 }
 0x174   : > { %v2829_v39 = vadd.f32 %v2828_v59, %v2739_v47 }
 0x176   : > { %2830 = vst.msk [vmem:[%s4880_s30] sm:$0xff] %vm642_vm2, %v2829_v39 }
 0x177   : > { %4195 = shalt.err (!%p4192_p5)
}
 0x178   : > { %4055 = dma.vmem_to_hbm [thread:$0]  (%p4344_p4), %s2846_s24, 128, %s2848_s0, %s2832_s28  }
 0x179 PF: > { %p4061_p6 = scmp.ge.s32.totalorder %s4246_s18, 2  ;;  %s2859_s30 = sand.u32 1, %s4226_s13  }
 0x17a   : > { %s2860_s16 = scalar_lea.sflag [#allocation3], %s2859_s30 }
 0x17b   : > { %p4058_p7 = pnand %p4061_p6, %p4351_p8 }
 0x17d   : > { %p4059_p9 = pneg %p4058_p7 }
 0x17f   : > { %4221 = dma.done.wait (%p4059_p9), %s2860_s16, 128  }
 0x180   : > { %4223 = vsyncadd (%p4059_p9), %s2860_s16, 4294967168  ;;  %s23_s18 = sadd.s32 1, %s4246_s18   ;;  %s4955_s13 = smov %s4230_s14 }
 0x181   : > { %p20_p10 = scmp.ge.s32.totalorder %s23_s18, 4   ;;  %s4956_s14 = smov %s4234_s15 }
 0x182   : > { %s4957_s15 = smov %s4357_s26  ;;  %s4958_s16 = smov %s4242_s17 }
 0x183   : > { %s4959_s17 = smov %s4961_s21  ;;  %22 = sbr.rel (!%p20_p10) target bundleno = 6 (0x6), region = 130 }
 0x188   :  { %2866 = vsyncpa [#allocation3], 1 }
 0x189   :  { %2868 = vsyncpa [#allocation3 + $0x1], 1 }

</bundles_post_ra>
